<compile_context>
chip_gen: v5e
topology: v5e:2x2
jax: 0.10.0
libtpu: 0.0.40
codegen_flags: <defaults>
</compile_context>

<pallas_src>
import math
from functools import partial

import jax
import jax.numpy as jnp
from jax import lax
from jax.experimental import pallas as pl
from jax.experimental.pallas import tpu as pltpu


def _attn_kernel(*refs, n_src: int, n_head: int, t_q: int, shared: bool,
                 fuse_qkv: bool, is_causal: bool):
    # refs = (x_q[, x_k, x_v], w_qkv, b_qkv, wp, bp, o_ref)
    x_refs = refs[:n_src]
    w_ref, bqkv_ref, wp_ref, bp_ref, o_ref = refs[n_src:]

    f32 = jnp.float32
    bf16 = jnp.bfloat16

    C = wp_ref.shape[-1]
    H = n_head
    D = C // H
    scale = 1.0 / math.sqrt(D)

    qi = pl.program_id(1)                       # query-tile index

    # ---- gather activation slabs (already bf16 from the wrapper) -----------
    if shared:
        x_kv = x_refs[0][0]                     # (T, C): single DMA per batch
        if fuse_qkv:                            # TQ == T
            xq = x_kv
        else:
            q_start = pl.multiple_of(qi * t_q, t_q)
            xq = x_refs[0][0, pl.ds(q_start, t_q), :]      # (TQ, C)
        xk = xv = x_kv
    else:
        xq = x_refs[0][0]                       # (TQ, C)
        xk = x_refs[1][0]                       # (T,  C)
        xv = x_refs[2][0]                       # (T,  C)

    # ---- fused, lane-dense QKV projection (MXU, bf16 in / f32 acc) ---------
    w = w_ref[...]                              # (C, 3C) bf16, VMEM-resident
    bqkv = bqkv_ref[...]                        # (1, 3C) f32

    if fuse_qkv:
        # shared source & full-T query tile: one wide matmul, N = 3C
        qkv = jnp.dot(xq, w, preferred_element_type=f32) + bqkv        # (T, 3C)
        q, k, v = qkv[:, :C], qkv[:, C:2 * C], qkv[:, 2 * C:]
    else:
        q = jnp.dot(xq, w[:, :C], preferred_element_type=f32) + bqkv[:, :C]
        k = jnp.dot(xk, w[:, C:2 * C], preferred_element_type=f32) + bqkv[:, C:2 * C]
        v = jnp.dot(xv, w[:, 2 * C:], preferred_element_type=f32) + bqkv[:, 2 * C:]

    TQ = q.shape[0]
    T_kv = k.shape[0]

    # Causal mask built once per grid step (hoisted out of the head loop);
    # applied to the f32 score accumulator so -1e30 never touches bf16.
    if is_causal:
        row = qi * t_q + lax.broadcasted_iota(jnp.int32, (TQ, T_kv), 0)
        col = lax.broadcasted_iota(jnp.int32, (TQ, T_kv), 1)
        causal_ok = col <= row

    q16, k16, v16 = q.astype(bf16), k.astype(bf16), v.astype(bf16)
    wp = wp_ref[...]                            # (C, C) bf16, VMEM-resident

    # ---- per-head attention + fused merge-heads / c_proj -------------------
    acc = None
    for h in range(H):                          # static unroll; H is small
        lo, hi = h * D, (h + 1) * D
        qh, kh, vh = q16[:, lo:hi], k16[:, lo:hi], v16[:, lo:hi]

        # scores: contract the head dim of both operands (no transpose)
        s = lax.dot_general(qh, kh, (((1,), (1,)), ((), ())),
                            preferred_element_type=f32) * scale        # (TQ, T)
        if is_causal:
            s = jnp.where(causal_ok, s, f32(-1e30))
        # TODO(synk): key_padding_mask would add a per-key bias to `s` here.

        # numerically stable f32 softmax; reciprocal uses the (idle) EUP slot
        m = jnp.max(s, axis=-1, keepdims=True)
        e = jnp.exp(s - m)
        p = e * pl.reciprocal(jnp.sum(e, axis=-1, keepdims=True), approx=True)

        yh = jnp.dot(p.astype(bf16), vh, preferred_element_type=f32)   # (TQ, D)

        # fused merge-heads + output projection:
        #   out = sum_h  y_h @ Wp^T[h*D:(h+1)*D, :]  + bp
        part = jnp.dot(yh.astype(bf16), wp[lo:hi, :],
                       preferred_element_type=f32)                     # (TQ, C)
        acc = part if acc is None else acc + part

    o_ref[0] = (acc + bp_ref[...]).astype(o_ref.dtype)


def self_attention(q_src, k_src=None, v_src=None, *, params, n_head: int,
                   is_causal: bool = False, q_tile: int | None = None,
                   vmem_limit_bytes: int = 48 * 1024 * 1024):
    """Pallas self/cross-attention. `params` holds transposed weights + biases."""
    if k_src is None:
        k_src = q_src
    if v_src is None:
        v_src = q_src

    B, T, C = q_src.shape
    assert C % n_head == 0
    H, D = n_head, C // n_head

    # NOTE: shared-source detection uses Python identity; equal-but-distinct
    # arrays fall back to the (correct but slower) 3-source DMA path.
    shared = (k_src is q_src) and (v_src is q_src)

    if q_tile is None:
        q_tile = T if T <= 256 else 256
    assert T % q_tile == 0 and (q_tile % 8 == 0 or q_tile == T)
    n_q_tiles = T // q_tile
    fuse_qkv = shared and n_q_tiles == 1

    # ---- wrapper-side layout plumbing (one-time XLA ops, not kernel work) --
    # All MXU operands in bf16; biases stay f32.  Q/K/V weights fused into a
    # single lane-dense (C, 3C) slab -> one wide projection matmul.
    bf16 = jnp.bfloat16
    w_qkv = jnp.concatenate(
        [params["wq_t"], params["wk_t"], params["wv_t"]], axis=1).astype(bf16)
    b_qkv = jnp.concatenate(
        [params["bq"], params["bk"], params["bv"]]).reshape(1, 3 * C).astype(jnp.float32)
    wp = params["wp_t"].astype(bf16)
    bp = params["bp"].reshape(1, C).astype(jnp.float32)

    if shared:
        x_inputs = (q_src.astype(bf16),)
        x_specs = [pl.BlockSpec((1, T, C), lambda b, qi: (b, 0, 0))]
    else:
        x_inputs = (q_src.astype(bf16), k_src.astype(bf16), v_src.astype(bf16))
        x_specs = [pl.BlockSpec((1, q_tile, C), lambda b, qi: (b, qi, 0)),
                   pl.BlockSpec((1, T, C), lambda b, qi: (b, 0, 0)),
                   pl.BlockSpec((1, T, C), lambda b, qi: (b, 0, 0))]

    # Weights: full-array blocks with constant index maps -> fetched from HBM
    # once and kept VMEM-resident across the whole grid (no per-batch re-DMA).
    in_specs = x_specs + [
        pl.BlockSpec((C, 3 * C), lambda b, qi: (0, 0)),   # w_qkv (bf16)
        pl.BlockSpec((1, 3 * C), lambda b, qi: (0, 0)),   # b_qkv (f32)
        pl.BlockSpec((C, C), lambda b, qi: (0, 0)),       # wp    (bf16)
        pl.BlockSpec((1, C), lambda b, qi: (0, 0)),       # bp    (f32)
    ]
    out_spec = pl.BlockSpec((1, q_tile, C), lambda b, qi: (b, qi, 0))

    kern = partial(_attn_kernel, n_src=len(x_inputs), n_head=H, t_q=q_tile,
                   shared=shared, fuse_qkv=fuse_qkv, is_causal=is_causal)

    return pl.pallas_call(
        kern,
        out_shape=jax.ShapeDtypeStruct((B, T, C), q_src.dtype),
        grid_spec=pltpu.PrefetchScalarGridSpec(
            num_scalar_prefetch=0,
            grid=(B, n_q_tiles),            # no reduction axis: both parallel
            in_specs=in_specs,
            out_specs=out_spec,
        ),
        compiler_params=pltpu.CompilerParams(
            dimension_semantics=("parallel", "parallel"),
            vmem_limit_bytes=vmem_limit_bytes),
    )(*x_inputs, w_qkv, b_qkv, wp, bp)


def _reference(q_src, k_src, v_src, params, *, n_head: int, is_causal: bool):
    """Pure-JAX f32 reference mirroring the PyTorch forward (eval mode)."""
    B, T, C = q_src.shape
    D = C // n_head

    def lin(x, w_t, b):
        return x @ w_t + b

    def split(x):  # (B,T,C) -> (B,H,T,D)
        return x.reshape(B, T, n_head, D).transpose(0, 2, 1, 3)

    q = split(lin(q_src, params["wq_t"], params["bq"]))
    k = split(lin(k_src, params["wk_t"], params["bk"]))
    v = split(lin(v_src, params["wv_t"], params["bv"]))

    s = jnp.einsum("bhqd,bhkd->bhqk", q, k) / math.sqrt(D)
    if is_causal:
        mask = jnp.tril(jnp.ones((T, T), dtype=bool))
        s = jnp.where(mask, s, -1e30)
    p = jax.nn.softmax(s, axis=-1)
    y = jnp.einsum("bhqk,bhkd->bhqd", p, v)
    y = y.transpose(0, 2, 1, 3).reshape(B, T, C)
    return lin(y, params["wp_t"], params["bp"])


def init_params(key, n_embd):
    """Deterministic torch.nn.Linear-style init (uniform(-1/sqrt(C), 1/sqrt(C)))."""
    bound = 1.0 / math.sqrt(n_embd)
    keys = jax.random.split(key, 8)

    def w(k):  # stored already transposed: (in, out)
        return jax.random.uniform(k, (n_embd, n_embd), jnp.float32, -bound, bound)

    def b(k):
        return jax.random.uniform(k, (n_embd,), jnp.float32, -bound, bound)

    return {
        "wq_t": w(keys[0]), "bq": b(keys[1]),
        "wk_t": w(keys[2]), "bk": b(keys[3]),
        "wv_t": w(keys[4]), "bv": b(keys[5]),
        "wp_t": w(keys[6]), "bp": b(keys[7]),
    }


if __name__ == "__main__":
    # config: n_embd=128 (lane-dense C), n_head=4, bias=True, dropout=0.0
    B, T, C, H = 2, 64, 128, 4

    key = jax.random.PRNGKey(0)
    kx, kk, kv, kp = jax.random.split(key, 4)
    x = jax.random.normal(kx, (B, T, C), dtype=jnp.float32)
    params = init_params(kp, C)

    # Tolerance covers bf16 MXU inputs (f32 accumulation) plus the approximate
    # EUP reciprocal in the softmax denominator; reference is exact f32.
    TOL = dict(atol=2e-2, rtol=2e-2)

    # 1) self-attention (shared source), non-causal, single q tile
    #    -> exercises the fused (C, 3C) single-projection fast path
    out = jax.block_until_ready(
        self_attention(x, params=params, n_head=H, is_causal=False))
    ref = _reference(x, x, x, params, n_head=H, is_causal=False)
    assert out.shape == (B, T, C)
    assert jnp.allclose(out, ref, **TOL), float(jnp.max(jnp.abs(out - ref)))

    # 2) causal self-attention with query tiling (2 q tiles)
    #    -> exercises in-kernel q-row slicing + global-row causal offsets
    out_c = jax.block_until_ready(
        self_attention(x, params=params, n_head=H, is_causal=True, q_tile=32))
    ref_c = _reference(x, x, x, params, n_head=H, is_causal=True)
    assert jnp.allclose(out_c, ref_c, **TOL), float(jnp.max(jnp.abs(out_c - ref_c)))

    # 3) cross-attention (distinct key/value sources), q-tiled, non-causal
    k_src = jax.random.normal(kk, (B, T, C), dtype=jnp.float32)
    v_src = jax.random.normal(kv, (B, T, C), dtype=jnp.float32)
    out_x = jax.block_until_ready(
        self_attention(x, k_src, v_src, params=params, n_head=H,
                       is_causal=False, q_tile=32))
    ref_x = _reference(x, k_src, v_src, params, n_head=H, is_causal=False)
    assert jnp.allclose(out_x, ref_x, **TOL), float(jnp.max(jnp.abs(out_x - ref_x)))

    print("KERNEL_OK")
</pallas_src>

<mosaic_0001>
module attributes {stable_mosaic.version = 11 : i64} {
  func.func @_attn_kernel(%arg0: i32, %arg1: i32, %arg2: memref<1x64x128xbf16, #tpu.memory_space<vmem>>, %arg3: memref<128x384xbf16, #tpu.memory_space<vmem>>, %arg4: memref<1x384xf32, #tpu.memory_space<vmem>>, %arg5: memref<128x128xbf16, #tpu.memory_space<vmem>>, %arg6: memref<1x128xf32, #tpu.memory_space<vmem>>, %arg7: memref<1x64x128xf32, #tpu.memory_space<vmem>>) attributes {dimension_semantics = [#tpu.dimension_semantics<parallel>, #tpu.dimension_semantics<parallel>], iteration_bounds = array<i64: 2, 1>, scalar_prefetch = 0 : i64, scratch_operands = 0 : i64, tpu.core_type = #tpu.core_type<tc>, window_params = [{transform_indices = @transform_0, window_bounds = array<i64: 1, 64, 128>}, {pipeline_mode = #tpu.pipeline_mode<synchronous>, transform_indices = @transform_1, window_bounds = array<i64: 128, 384>}, {pipeline_mode = #tpu.pipeline_mode<synchronous>, transform_indices = @transform_2, window_bounds = array<i64: 1, 384>}, {pipeline_mode = #tpu.pipeline_mode<synchronous>, transform_indices = @transform_3, window_bounds = array<i64: 128, 128>}, {pipeline_mode = #tpu.pipeline_mode<synchronous>, transform_indices = @transform_4, window_bounds = array<i64: 1, 128>}, {transform_indices = @transform_5, window_bounds = array<i64: 1, 64, 128>}]} {
    %c0 = arith.constant 0 : index
    %c0_0 = arith.constant 0 : index
    %c0_1 = arith.constant 0 : index
    %0 = vector.load %arg2[%c0, %c0_0, %c0_1] : memref<1x64x128xbf16, #tpu.memory_space<vmem>>, vector<1x64x128xbf16>
    %1 = vector.shape_cast %0 : vector<1x64x128xbf16> to vector<64x128xbf16>
    %c0_2 = arith.constant 0 : index
    %c0_3 = arith.constant 0 : index
    %2 = vector.load %arg3[%c0_2, %c0_3] : memref<128x384xbf16, #tpu.memory_space<vmem>>, vector<128x384xbf16>
    %c0_4 = arith.constant 0 : index
    %c0_5 = arith.constant 0 : index
    %3 = vector.load %arg4[%c0_4, %c0_5] : memref<1x384xf32, #tpu.memory_space<vmem>>, vector<1x384xf32>
    %cst = arith.constant dense<0.000000e+00> : vector<64x384xf32>
    %4 = tpu.matmul %1, %2, %cst {dimension_numbers = #tpu.dot_dimension_numbers<[1], [0], [0], [1], [0, 0, 1, 1], [], []>} : vector<64x128xbf16>, vector<128x384xbf16>, vector<64x384xf32> -> vector<64x384xf32>
    %5 = vector.broadcast %3 : vector<1x384xf32> to vector<64x384xf32>
    %6 = arith.addf %4, %5 : vector<64x384xf32>
    %7 = vector.extract_strided_slice %6 {offsets = [0, 0], sizes = [64, 128], strides = [1, 1]} : vector<64x384xf32> to vector<64x128xf32>
    %8 = vector.extract_strided_slice %6 {offsets = [0, 128], sizes = [64, 128], strides = [1, 1]} : vector<64x384xf32> to vector<64x128xf32>
    %9 = vector.extract_strided_slice %6 {offsets = [0, 256], sizes = [64, 128], strides = [1, 1]} : vector<64x384xf32> to vector<64x128xf32>
    %10 = arith.truncf %7 : vector<64x128xf32> to vector<64x128xbf16>
    %11 = arith.truncf %8 : vector<64x128xf32> to vector<64x128xbf16>
    %12 = arith.truncf %9 : vector<64x128xf32> to vector<64x128xbf16>
    %c0_6 = arith.constant 0 : index
    %c0_7 = arith.constant 0 : index
    %13 = vector.load %arg5[%c0_6, %c0_7] : memref<128x128xbf16, #tpu.memory_space<vmem>>, vector<128x128xbf16>
    %14 = vector.extract_strided_slice %10 {offsets = [0, 0], sizes = [64, 32], strides = [1, 1]} : vector<64x128xbf16> to vector<64x32xbf16>
    %15 = vector.extract_strided_slice %11 {offsets = [0, 0], sizes = [64, 32], strides = [1, 1]} : vector<64x128xbf16> to vector<64x32xbf16>
    %16 = vector.extract_strided_slice %12 {offsets = [0, 0], sizes = [64, 32], strides = [1, 1]} : vector<64x128xbf16> to vector<64x32xbf16>
    %cst_8 = arith.constant dense<0.000000e+00> : vector<64x64xf32>
    %17 = tpu.matmul %14, %15, %cst_8 {dimension_numbers = #tpu.dot_dimension_numbers<[1], [1], [0], [0], [0, 0, 1, 0], [], []>} : vector<64x32xbf16>, vector<64x32xbf16>, vector<64x64xf32> -> vector<64x64xf32>
    %cst_9 = arith.constant 0.176776692 : f32
    %18 = vector.broadcast %cst_9 : f32 to vector<64x64xf32>
    %19 = arith.mulf %17, %18 : vector<64x64xf32>
    %cst_10 = arith.constant dense<0xFF800000> : vector<64xf32>
    %20 = vector.multi_reduction <maximumf>, %19, %cst_10 [1] : vector<64x64xf32> to vector<64xf32>
    %21 = vector.shape_cast %20 : vector<64xf32> to vector<64x1xf32>
    %22 = vector.broadcast %21 : vector<64x1xf32> to vector<64x64xf32>
    %23 = arith.subf %19, %22 : vector<64x64xf32>
    %24 = math.exp %23 : vector<64x64xf32>
    %cst_11 = arith.constant dense<0.000000e+00> : vector<64xf32>
    %25 = vector.multi_reduction <add>, %24, %cst_11 [1] : vector<64x64xf32> to vector<64xf32>
    %26 = vector.shape_cast %25 : vector<64xf32> to vector<64x1xf32>
    %27 = tpu.reciprocal %26 {approx = true} : vector<64x1xf32> -> vector<64x1xf32>
    %28 = vector.broadcast %27 : vector<64x1xf32> to vector<64x64xf32>
    %29 = arith.mulf %24, %28 : vector<64x64xf32>
    %30 = arith.truncf %29 : vector<64x64xf32> to vector<64x64xbf16>
    %cst_12 = arith.constant dense<0.000000e+00> : vector<64x32xf32>
    %31 = tpu.matmul %30, %16, %cst_12 {dimension_numbers = #tpu.dot_dimension_numbers<[1], [0], [0], [1], [0, 0, 1, 1], [], []>} : vector<64x64xbf16>, vector<64x32xbf16>, vector<64x32xf32> -> vector<64x32xf32>
    %32 = arith.truncf %31 : vector<64x32xf32> to vector<64x32xbf16>
    %33 = vector.extract_strided_slice %13 {offsets = [0, 0], sizes = [32, 128], strides = [1, 1]} : vector<128x128xbf16> to vector<32x128xbf16>
    %cst_13 = arith.constant dense<0.000000e+00> : vector<64x128xf32>
    %34 = tpu.matmul %32, %33, %cst_13 {dimension_numbers = #tpu.dot_dimension_numbers<[1], [0], [0], [1], [0, 0, 1, 1], [], []>} : vector<64x32xbf16>, vector<32x128xbf16>, vector<64x128xf32> -> vector<64x128xf32>
    %35 = vector.extract_strided_slice %10 {offsets = [0, 32], sizes = [64, 32], strides = [1, 1]} : vector<64x128xbf16> to vector<64x32xbf16>
    %36 = vector.extract_strided_slice %11 {offsets = [0, 32], sizes = [64, 32], strides = [1, 1]} : vector<64x128xbf16> to vector<64x32xbf16>
    %37 = vector.extract_strided_slice %12 {offsets = [0, 32], sizes = [64, 32], strides = [1, 1]} : vector<64x128xbf16> to vector<64x32xbf16>
    %cst_14 = arith.constant dense<0.000000e+00> : vector<64x64xf32>
    %38 = tpu.matmul %35, %36, %cst_14 {dimension_numbers = #tpu.dot_dimension_numbers<[1], [1], [0], [0], [0, 0, 1, 0], [], []>} : vector<64x32xbf16>, vector<64x32xbf16>, vector<64x64xf32> -> vector<64x64xf32>
    %cst_15 = arith.constant 0.176776692 : f32
    %39 = vector.broadcast %cst_15 : f32 to vector<64x64xf32>
    %40 = arith.mulf %38, %39 : vector<64x64xf32>
    %cst_16 = arith.constant dense<0xFF800000> : vector<64xf32>
    %41 = vector.multi_reduction <maximumf>, %40, %cst_16 [1] : vector<64x64xf32> to vector<64xf32>
    %42 = vector.shape_cast %41 : vector<64xf32> to vector<64x1xf32>
    %43 = vector.broadcast %42 : vector<64x1xf32> to vector<64x64xf32>
    %44 = arith.subf %40, %43 : vector<64x64xf32>
    %45 = math.exp %44 : vector<64x64xf32>
    %cst_17 = arith.constant dense<0.000000e+00> : vector<64xf32>
    %46 = vector.multi_reduction <add>, %45, %cst_17 [1] : vector<64x64xf32> to vector<64xf32>
    %47 = vector.shape_cast %46 : vector<64xf32> to vector<64x1xf32>
    %48 = tpu.reciprocal %47 {approx = true} : vector<64x1xf32> -> vector<64x1xf32>
    %49 = vector.broadcast %48 : vector<64x1xf32> to vector<64x64xf32>
    %50 = arith.mulf %45, %49 : vector<64x64xf32>
    %51 = arith.truncf %50 : vector<64x64xf32> to vector<64x64xbf16>
    %cst_18 = arith.constant dense<0.000000e+00> : vector<64x32xf32>
    %52 = tpu.matmul %51, %37, %cst_18 {dimension_numbers = #tpu.dot_dimension_numbers<[1], [0], [0], [1], [0, 0, 1, 1], [], []>} : vector<64x64xbf16>, vector<64x32xbf16>, vector<64x32xf32> -> vector<64x32xf32>
    %53 = arith.truncf %52 : vector<64x32xf32> to vector<64x32xbf16>
    %54 = vector.extract_strided_slice %13 {offsets = [32, 0], sizes = [32, 128], strides = [1, 1]} : vector<128x128xbf16> to vector<32x128xbf16>
    %cst_19 = arith.constant dense<0.000000e+00> : vector<64x128xf32>
    %55 = tpu.matmul %53, %54, %cst_19 {dimension_numbers = #tpu.dot_dimension_numbers<[1], [0], [0], [1], [0, 0, 1, 1], [], []>} : vector<64x32xbf16>, vector<32x128xbf16>, vector<64x128xf32> -> vector<64x128xf32>
    %56 = arith.addf %34, %55 : vector<64x128xf32>
    %57 = vector.extract_strided_slice %10 {offsets = [0, 64], sizes = [64, 32], strides = [1, 1]} : vector<64x128xbf16> to vector<64x32xbf16>
    %58 = vector.extract_strided_slice %11 {offsets = [0, 64], sizes = [64, 32], strides = [1, 1]} : vector<64x128xbf16> to vector<64x32xbf16>
    %59 = vector.extract_strided_slice %12 {offsets = [0, 64], sizes = [64, 32], strides = [1, 1]} : vector<64x128xbf16> to vector<64x32xbf16>
    %cst_20 = arith.constant dense<0.000000e+00> : vector<64x64xf32>
    %60 = tpu.matmul %57, %58, %cst_20 {dimension_numbers = #tpu.dot_dimension_numbers<[1], [1], [0], [0], [0, 0, 1, 0], [], []>} : vector<64x32xbf16>, vector<64x32xbf16>, vector<64x64xf32> -> vector<64x64xf32>
    %cst_21 = arith.constant 0.176776692 : f32
    %61 = vector.broadcast %cst_21 : f32 to vector<64x64xf32>
    %62 = arith.mulf %60, %61 : vector<64x64xf32>
    %cst_22 = arith.constant dense<0xFF800000> : vector<64xf32>
    %63 = vector.multi_reduction <maximumf>, %62, %cst_22 [1] : vector<64x64xf32> to vector<64xf32>
    %64 = vector.shape_cast %63 : vector<64xf32> to vector<64x1xf32>
    %65 = vector.broadcast %64 : vector<64x1xf32> to vector<64x64xf32>
    %66 = arith.subf %62, %65 : vector<64x64xf32>
    %67 = math.exp %66 : vector<64x64xf32>
    %cst_23 = arith.constant dense<0.000000e+00> : vector<64xf32>
    %68 = vector.multi_reduction <add>, %67, %cst_23 [1] : vector<64x64xf32> to vector<64xf32>
    %69 = vector.shape_cast %68 : vector<64xf32> to vector<64x1xf32>
    %70 = tpu.reciprocal %69 {approx = true} : vector<64x1xf32> -> vector<64x1xf32>
    %71 = vector.broadcast %70 : vector<64x1xf32> to vector<64x64xf32>
    %72 = arith.mulf %67, %71 : vector<64x64xf32>
    %73 = arith.truncf %72 : vector<64x64xf32> to vector<64x64xbf16>
    %cst_24 = arith.constant dense<0.000000e+00> : vector<64x32xf32>
    %74 = tpu.matmul %73, %59, %cst_24 {dimension_numbers = #tpu.dot_dimension_numbers<[1], [0], [0], [1], [0, 0, 1, 1], [], []>} : vector<64x64xbf16>, vector<64x32xbf16>, vector<64x32xf32> -> vector<64x32xf32>
    %75 = arith.truncf %74 : vector<64x32xf32> to vector<64x32xbf16>
    %76 = vector.extract_strided_slice %13 {offsets = [64, 0], sizes = [32, 128], strides = [1, 1]} : vector<128x128xbf16> to vector<32x128xbf16>
    %cst_25 = arith.constant dense<0.000000e+00> : vector<64x128xf32>
    %77 = tpu.matmul %75, %76, %cst_25 {dimension_numbers = #tpu.dot_dimension_numbers<[1], [0], [0], [1], [0, 0, 1, 1], [], []>} : vector<64x32xbf16>, vector<32x128xbf16>, vector<64x128xf32> -> vector<64x128xf32>
    %78 = arith.addf %56, %77 : vector<64x128xf32>
    %79 = vector.extract_strided_slice %10 {offsets = [0, 96], sizes = [64, 32], strides = [1, 1]} : vector<64x128xbf16> to vector<64x32xbf16>
    %80 = vector.extract_strided_slice %11 {offsets = [0, 96], sizes = [64, 32], strides = [1, 1]} : vector<64x128xbf16> to vector<64x32xbf16>
    %81 = vector.extract_strided_slice %12 {offsets = [0, 96], sizes = [64, 32], strides = [1, 1]} : vector<64x128xbf16> to vector<64x32xbf16>
    %cst_26 = arith.constant dense<0.000000e+00> : vector<64x64xf32>
    %82 = tpu.matmul %79, %80, %cst_26 {dimension_numbers = #tpu.dot_dimension_numbers<[1], [1], [0], [0], [0, 0, 1, 0], [], []>} : vector<64x32xbf16>, vector<64x32xbf16>, vector<64x64xf32> -> vector<64x64xf32>
    %cst_27 = arith.constant 0.176776692 : f32
    %83 = vector.broadcast %cst_27 : f32 to vector<64x64xf32>
    %84 = arith.mulf %82, %83 : vector<64x64xf32>
    %cst_28 = arith.constant dense<0xFF800000> : vector<64xf32>
    %85 = vector.multi_reduction <maximumf>, %84, %cst_28 [1] : vector<64x64xf32> to vector<64xf32>
    %86 = vector.shape_cast %85 : vector<64xf32> to vector<64x1xf32>
    %87 = vector.broadcast %86 : vector<64x1xf32> to vector<64x64xf32>
    %88 = arith.subf %84, %87 : vector<64x64xf32>
    %89 = math.exp %88 : vector<64x64xf32>
    %cst_29 = arith.constant dense<0.000000e+00> : vector<64xf32>
    %90 = vector.multi_reduction <add>, %89, %cst_29 [1] : vector<64x64xf32> to vector<64xf32>
    %91 = vector.shape_cast %90 : vector<64xf32> to vector<64x1xf32>
    %92 = tpu.reciprocal %91 {approx = true} : vector<64x1xf32> -> vector<64x1xf32>
    %93 = vector.broadcast %92 : vector<64x1xf32> to vector<64x64xf32>
    %94 = arith.mulf %89, %93 : vector<64x64xf32>
    %95 = arith.truncf %94 : vector<64x64xf32> to vector<64x64xbf16>
    %cst_30 = arith.constant dense<0.000000e+00> : vector<64x32xf32>
    %96 = tpu.matmul %95, %81, %cst_30 {dimension_numbers = #tpu.dot_dimension_numbers<[1], [0], [0], [1], [0, 0, 1, 1], [], []>} : vector<64x64xbf16>, vector<64x32xbf16>, vector<64x32xf32> -> vector<64x32xf32>
    %97 = arith.truncf %96 : vector<64x32xf32> to vector<64x32xbf16>
    %98 = vector.extract_strided_slice %13 {offsets = [96, 0], sizes = [32, 128], strides = [1, 1]} : vector<128x128xbf16> to vector<32x128xbf16>
    %cst_31 = arith.constant dense<0.000000e+00> : vector<64x128xf32>
    %99 = tpu.matmul %97, %98, %cst_31 {dimension_numbers = #tpu.dot_dimension_numbers<[1], [0], [0], [1], [0, 0, 1, 1], [], []>} : vector<64x32xbf16>, vector<32x128xbf16>, vector<64x128xf32> -> vector<64x128xf32>
    %100 = arith.addf %78, %99 : vector<64x128xf32>
    %c0_32 = arith.constant 0 : index
    %c0_33 = arith.constant 0 : index
    %101 = vector.load %arg6[%c0_32, %c0_33] : memref<1x128xf32, #tpu.memory_space<vmem>>, vector<1x128xf32>
    %102 = vector.broadcast %101 : vector<1x128xf32> to vector<64x128xf32>
    %103 = arith.addf %100, %102 : vector<64x128xf32>
    %c0_34 = arith.constant 0 : index
    %c0_35 = arith.constant 0 : index
    %c0_36 = arith.constant 0 : index
    %104 = vector.load %arg7[%c0_34, %c0_35, %c0_36] : memref<1x64x128xf32, #tpu.memory_space<vmem>>, vector<1x64x128xf32>
    %105 = vector.shape_cast %104 : vector<1x64x128xf32> to vector<64x128xf32>
    %106 = vector.shape_cast %103 : vector<64x128xf32> to vector<1x64x128xf32>
    tpu.vector_store %arg7[%c0_34, %c0_35, %c0_36], %106 {strides = array<i32>} : memref<1x64x128xf32, #tpu.memory_space<vmem>>, vector<1x64x128xf32>,
    return
  }
  func.func @transform_0(%arg0: i32, %arg1: i32) -> (i32, i32, i32) {
    %c0_i32 = arith.constant 0 : i32
    %c0_i32_0 = arith.constant 0 : i32
    %c0_i32_1 = arith.constant 0 : i32
    return %arg0, %c0_i32, %c0_i32_0 : i32, i32, i32
  }
  func.func @transform_1(%arg0: i32, %arg1: i32) -> (i32, i32) {
    %c0_i32 = arith.constant 0 : i32
    %c0_i32_0 = arith.constant 0 : i32
    %c0_i32_1 = arith.constant 0 : i32
    return %c0_i32, %c0_i32_0 : i32, i32
  }
  func.func @transform_2(%arg0: i32, %arg1: i32) -> (i32, i32) {
    %c0_i32 = arith.constant 0 : i32
    %c0_i32_0 = arith.constant 0 : i32
    %c0_i32_1 = arith.constant 0 : i32
    return %c0_i32, %c0_i32_0 : i32, i32
  }
  func.func @transform_3(%arg0: i32, %arg1: i32) -> (i32, i32) {
    %c0_i32 = arith.constant 0 : i32
    %c0_i32_0 = arith.constant 0 : i32
    %c0_i32_1 = arith.constant 0 : i32
    return %c0_i32, %c0_i32_0 : i32, i32
  }
  func.func @transform_4(%arg0: i32, %arg1: i32) -> (i32, i32) {
    %c0_i32 = arith.constant 0 : i32
    %c0_i32_0 = arith.constant 0 : i32
    %c0_i32_1 = arith.constant 0 : i32
    return %c0_i32, %c0_i32_0 : i32, i32
  }
  func.func @transform_5(%arg0: i32, %arg1: i32) -> (i32, i32, i32) {
    %c0_i32 = arith.constant 0 : i32
    %c0_i32_0 = arith.constant 0 : i32
    return %arg0, %arg1, %c0_i32 : i32, i32, i32
  }
}

</mosaic_0001>

<bundles_post_ra>
// kernel: tpu_custom_call.1
= control target key start
LH: loop header
LB: loop body
LE: loop exit
PB: predicated region body
PF: predicated region fallthrough
CT: control target
= control target key end

     0   :  { %s3492_s0 = inlined_call_operand.hbm [shape: bf16[2,64,128], index: 0, kind: input, shape index: {}]   ;;  %s3493_s1 = inlined_call_operand.hbm [shape: bf16[128,384], index: 1, kind: input, shape index: {}]   ;;  %s3494_s2 = inlined_call_operand.hbm [shape: f32[1,384], index: 2, kind: input, shape index: {}]   ;;  %s3495_s3 = inlined_call_operand.hbm [shape: bf16[128,128], index: 3, kind: input, shape index: {}]   ;;  %s3496_s4 = inlined_call_operand.vmem [shape: f32[1,128], index: 4, kind: input, shape index: {}]   ;;  %s3497_s5 = inlined_call_operand.hbm [shape: f32[2,64,128], index: 5, kind: output, shape index: {}]  }
   0x1   :  { %3500 = sst [smem:[#allocation15_spill]] %s3493_s1 }
   0x2   :  { %3501 = sst [smem:[#allocation16_spill]] %s3494_s2 }
   0x3   :  { %3502 = sst [smem:[#allocation17_spill]] %s3495_s3 }
   0x4   :  { %10 = vsyncpa [#allocation3], 0 }
   0x5   :  { %12 = vsyncpa [#allocation3 + $0x1], 0 }
   0x6   :  { %13 = vsyncpa [#allocation6], 0 }
   0x7   :  { %14 = vsyncpa [#allocation9], 0 }
   0x8   :  { %15 = vsyncpa [#allocation4], 0 }
   0x9   :  { %17 = vsyncpa [#allocation4 + $0x1], 0  ;;  %s2707_s18 = smov 0   ;;  %s2709_s19 = smov 0  }
   0xa   :  { %s2711_s20 = smov 0   ;;  %s2713_s21 = smov 0  }
   0xb   :  { %s2715_s22 = smov 0   ;;  %s2717_s23 = smov 0  }
   0xc LB: > { %s1957_s24 = sadd.s32 4294967295, %s2663_s23   ;;  %s1958_s25 = sadd.s32 4294967294, %s2663_s23   ;;  %s2663_s23 = sphi %s2717_s23, %s23_s23   ;;  %s2659_s22 = sphi %s2715_s22, %s3520_s22   ;;  %s2655_s21 = sphi %s2713_s21, %s3519_s21   ;;  %s2651_s20 = sphi %s2711_s20, %s3518_s20   ;;  %s2647_s19 = sphi %s2709_s19, %s3517_s19   ;;  %s2643_s18 = sphi %s2707_s18, %s3516_s18  }
   0xd   : > { %p55_p0 = scmp.ne.s32.totalorder %s2647_s19, %s2643_s18  ;;  %p2741_p1 = scmp.eq.s32.totalorder %s1957_s24, 0 }
   0xe   : > { %p2745_p2 = scmp.eq.s32.totalorder %s1957_s24, 1  ;;  %p171_p3 = scmp.eq.s32.totalorder %s1958_s25, 1 }
   0xf   : > { %p2751_p4 = por %p2741_p1, %p55_p0  ;;  %p1959_p5 = scmp.ge.s32.totalorder %s2663_s23, 1 }
  0x10   : > { %p2756_p6 = por %p171_p3, %p55_p0  ;;  %p178_p7 = scmp.lt.s32.totalorder %s2663_s23, 3 }
  0x11   : > { %s3507_s1 = sld [smem:[#allocation15_spill]]  ;;  %s2665_s9 = smov [#allocation5]  }
  0x12   : > { %p2764_p8 = pnand %p1959_p5, %p178_p7  ;;  %s191_s10 = sshll.u32 %s2665_s9, 4  ;;  %s192_s10 = int_to_ptr.vmem [resolvable:$true] %s191_s10 }
  0x13   : > { %p1963_p11 = scmp.ge.s32.totalorder %s2663_s23, 2  ;;  %s3510_s2 = sld [smem:[#allocation16_spill]] }
  0x14   : > { %p2238_p9 = pneg %p2764_p8  ;;  %s2666_s15 = smov 192  }
  0x15   : > { %s2667_s16 = smov 12   ;;  %s2668_s17 = smov [#allocation7]  }
  0x16   : > { %p2772_p10 = pnand %p2238_p9, %p2741_p1  ;;  %s206_s24 = sshll.u32 %s2668_s17, 4  ;;  %s207_s24 = int_to_ptr.vmem [resolvable:$true] %s206_s24 }
  0x17   : > { %s189_s7 = sshll.u32 %s3507_s1, 4  ;;  %s3511_s3 = sld [smem:[#allocation17_spill]]  ;;  %s190_s7 = int_to_ptr.hbm [resolvable:$true] %s189_s7 }
  0x18   : > { %2241 = dma.hbm_to_vmem [thread:$0]  (!%p2772_p10), %s190_s7, 3072, %s192_s10, [#allocation6], %s2666_s15, %s2666_s15, %s2667_s16  }
  0x19   : > { %s204_s14 = sshll.u32 %s3510_s2, 4  ;;  %s2669_s9 = smov [#allocation8]   ;;  %s205_s14 = int_to_ptr.hbm [resolvable:$true] %s204_s14 }
  0x1a   : > { %2244 = dma.hbm_to_vmem [thread:$0]  (!%p2772_p10), %s205_s14, 48, %s207_s24, [#allocation6]  }
  0x1b   : > { %s217_s12 = sshll.u32 %s2669_s9, 4  ;;  %s3498_s13 = smov 64   ;;  %s218_s12 = int_to_ptr.vmem [resolvable:$true] %s217_s12 }
  0x1c   : > { %s3499_s7 = smov 4   ;;  %s42_s10 = sadd.s32 1, %s2651_s20 }
  0x1d   : > { %s215_s6 = sshll.u32 %s3511_s3, 4  ;;  %s35_s15 = sadd.s32 1, %s2659_s22  ;;  %s216_s6 = int_to_ptr.hbm [resolvable:$true] %s215_s6 }
  0x1e   : > { %2247 = dma.hbm_to_vmem [thread:$0]  (!%p2772_p10), %s216_s6, 1024, %s218_s12, [#allocation9], %s3498_s13, %s3498_s13, %s3499_s7  }
  0x1f   : > { %p49_p12 = scmp.ne.s32.totalorder %s2651_s20, %s2647_s19  ;;  %p37_p13 = scmp.ge.s32.totalorder %s35_s15, 2 }
  0x20   : > { %p50_p0 = scmp.eq.s32.totalorder %s2663_s23, 0  ;;  %p2259_p5 = scmp.lt.s32.totalorder %s2663_s23, 2 }
  0x21   : > { %p2799_p3 = por %p2745_p2, %p49_p12  ;;  %s3522_s15 = smov (%p37_p13, %s35_s15), 0 }
  0x22   : > { %p2806_p7 = por %p50_p0, %p49_p12  ;;  %s234_s16 = sand.u32 1, %s2651_s20  }
  0x23   : > { %s39_s17 = ssub.s32 %s2659_s22, %s3522_s15  ;;  %s1964_s24 = sshll.u32 %s234_s16, 5 }
  0x24   : > { %p40_p9 = scmp.eq.s32.totalorder %s39_s17, 0  ;;  %s2170_s25 = sshll.u32 %s2659_s22, 5 }
  0x25   : > { %s243_s9 = scalar_lea.hbm %s3492_s0, %s2170_s25  ;;  %s238_s12 = scalar_lea.vmem [#allocation2], %s1964_s24 }
  0x26   : > { %s2815_s27 = scalar_select %p40_p9, %s2651_s20, %s42_s10  }
  0x27   : > { %s246_s13 = sshll.u32 %s238_s12, 4  ;;  %s244_s7 = sshll.u32 %s243_s9, 4  ;;  %s247_s13 = int_to_ptr.vmem [resolvable:$true] %s246_s13  ;;  %s245_s7 = int_to_ptr.hbm [resolvable:$true] %s244_s7 }
  0x28   : > { %p2249_p2 = pnand %p2259_p5, %p2806_p7  ;;  %s235_s1 = scalar_lea.sflag [#allocation3], %s234_s16 }
  0x29   : > { %s3514_s2 = smov 4   ;;  %s3515_s3 = smov 64  }
  0x2a   : > { %2251 = dma.hbm_to_vmem [thread:$0]  (!%p2249_p2), %s245_s7, 512, %s247_s13, %s235_s1, %s3515_s3, %s3515_s3, %s3514_s2  }
  0x2b   : > { %258 = sbr.rel (%p2764_p8) target bundleno = 1741 (0x6cd), region = 40  ;;  %s2830_s10 = sand.u32 (!%p2764_p8), 1, %s2647_s19  }
  0x2c   : > { %s1968_s17 = sshll.u32 (!%p2764_p8), %s2830_s10, 5  ;;  %s261_s24 = scalar_lea.sflag (!%p2764_p8), [#allocation3], %s2830_s10 }
  0x2d   : > { %s2834_s25 = scalar_lea.vmem (!%p2764_p8), [#allocation2], %s1968_s17 }
  0x30   : > { %2626 = dma.done.wait (%p2751_p4), %s261_s24, 512  }
  0x31   : > { %2628 = vsyncadd (%p2751_p4), %s261_s24, 4294966784 }
  0x32   : > { %2630 = dma.done.wait (%p2741_p1), [#allocation6], 3120  }
  0x33   : > { %2632 = vsyncadd (%p2741_p1), [#allocation6], 4294964176 }
  0x34   : > { %2634 = dma.done.wait (%p2741_p1), [#allocation9], 1024  }
  0x35   : > { %2636 = vsyncadd (%p2741_p1), [#allocation9], 4294966272  ;;  %v2075_v0 = vld [vmem:[#allocation5 + $0xa8] sm:$0xf]  ;;  %v2197_v1 = vld [vmem:[#allocation5 + $0xb0] sm:$0xf0] }
  0x36   : > { %v2196_v2 = vld [vmem:[#allocation5 + $0xac] sm:$0xf]  ;;  %v2076_v3 = vor.u32 %v2197_v1, %v2075_v0  ;;  %v2077_v4 = vld [vmem:[#allocation5 + $0xb4] sm:$0xf0]  ;;  %v2063_v5 = vld [vmem:[#allocation5 + $0x90] sm:$0xf] }
  0x37   : > { %v2194_v6 = vld [vmem:[#allocation5 + $0x98] sm:$0xf0]  ;;  %v2080_v7 = vor.u32 %v2196_v2, %v2077_v4  ;;  %v2193_v8 = vld [vmem:[#allocation5 + $0x94] sm:$0xf]  ;;  %v2065_v9 = vld [vmem:[#allocation5 + $0x9c] sm:$0xf0] }
  0x38   : > { %509 = vmatpush.bf16.msra.mxu0 %v2076_v3  ;;  %v2064_v10 = vor.u32 %v2194_v6, %v2063_v5  ;;  %v2068_v11 = vor.u32 %v2193_v8, %v2065_v9  ;;  %v2051_v12 = vld [vmem:[#allocation5 + $0x78] sm:$0xf]  ;;  %v2191_v13 = vld [vmem:[#allocation5 + $0x80] sm:$0xf0]  ;;  %v2190_v14 = vld [vmem:[#allocation5 + $0x7c] sm:$0xf] }
  0x39   : > { %2208 = vmatpush.bf16.msra.mxu1 %v2080_v7  ;;  %v2053_v15 = vld [vmem:[#allocation5 + $0x84] sm:$0xf0]  ;;  %v2052_v16 = vor.u32 %v2191_v13, %v2051_v12  ;;  %v2039_v18 = vld [vmem:[#allocation5 + $0x60] sm:$0xf]  ;;  %v2188_v19 = vld [vmem:[#allocation5 + $0x68] sm:$0xf0] }
  0x3a   : > { %v2056_v17 = vor.u32 %v2190_v14, %v2053_v15  ;;  %v2187_v20 = vld [vmem:[#allocation5 + $0x64] sm:$0xf]  ;;  %v2041_v21 = vld [vmem:[#allocation5 + $0x6c] sm:$0xf0]  ;;  %v2040_v22 = vor.u32 %v2188_v19, %v2039_v18  ;;  %v2027_v24 = vld [vmem:[#allocation5 + $0x48] sm:$0xf] }
  0x3b   : > { %v2044_v23 = vor.u32 %v2187_v20, %v2041_v21  ;;  %v2185_v25 = vld [vmem:[#allocation5 + $0x50] sm:$0xf0]  ;;  %v2184_v26 = vld [vmem:[#allocation5 + $0x4c] sm:$0xf]  ;;  %v2029_v27 = vld [vmem:[#allocation5 + $0x54] sm:$0xf0] }
  0x3c   : > { %510 = vmatpush.bf16.msra.mxu0 %v2064_v10  ;;  %v2028_v28 = vor.u32 %v2185_v25, %v2027_v24  ;;  %v2032_v29 = vor.u32 %v2184_v26, %v2029_v27  ;;  %v2015_v30 = vld [vmem:[#allocation5 + $0x30] sm:$0xf]  ;;  %v2182_v31 = vld [vmem:[#allocation5 + $0x38] sm:$0xf0]  ;;  %v2181_v32 = vld [vmem:[#allocation5 + $0x34] sm:$0xf] }
  0x3d   : > { %2209 = vmatpush.bf16.msra.mxu1 %v2068_v11  ;;  %v2017_v33 = vld [vmem:[#allocation5 + $0x3c] sm:$0xf0]  ;;  %v2016_v34 = vor.u32 %v2182_v31, %v2015_v30  ;;  %v2003_v36 = vld [vmem:[#allocation5 + $0x18] sm:$0xf]  ;;  %v2179_v37 = vld [vmem:[#allocation5 + $0x20] sm:$0xf0] }
  0x3e   : > { %v2020_v35 = vor.u32 %v2181_v32, %v2017_v33  ;;  %v2178_v38 = vld [vmem:[#allocation5 + $0x1c] sm:$0xf]  ;;  %v2005_v39 = vld [vmem:[#allocation5 + $0x24] sm:$0xf0]  ;;  %v2004_v40 = vor.u32 %v2179_v37, %v2003_v36  ;;  %v1991_v42 = vld [vmem:[#allocation5] sm:$0xf] }
  0x3f   : > { %v2008_v41 = vor.u32 %v2178_v38, %v2005_v39  ;;  %v2176_v43 = vld [vmem:[#allocation5 + $0x8] sm:$0xf0]  ;;  %v2175_v44 = vld [vmem:[#allocation5 + $0x4] sm:$0xf]  ;;  %v1993_v45 = vld [vmem:[#allocation5 + $0xc] sm:$0xf0] }
  0x40   : > { %511 = vmatpush.bf16.msra.mxu0 %v2052_v16  ;;  %v1992_v46 = vor.u32 %v2176_v43, %v1991_v42  ;;  %v1996_v47 = vor.u32 %v2175_v44, %v1993_v45  ;;  %v2849_v48 = vld [vmem:[%s2834_s25] sm:$0xff]  ;;  %v2852_v49 = vld [vmem:[%s2834_s25 + $0x8] sm:$0xff]  ;;  %v2857_v50 = vld [vmem:[%s2834_s25 + $0x10] sm:$0xff]  ;;  %s2672_s1 = smov 96   ;;  %vm676_vm0 = vcmask 261120   ;;  %vm738_vm1 = vcmask 523264  }
  0x41   : > { %2210 = vmatpush.bf16.msra.mxu1 %v2056_v17  ;;  %v2862_v51 = vld [vmem:[%s2834_s25 + $0x18] sm:$0xff]  ;;  %v2868_v52 = vld [vmem:[#allocation7] sm:$0x7]  ;;  %s2673_s2 = smov 64   ;;  %s2674_s3 = smov 32  }
  0x42   : > { %v352_v54 = vperm.slane %v2868_v52, 1  ;;  %v351_v24 = vperm.slane %v2868_v52, 0  ;;  %s1972_s26 = sshll.u32 %s2830_s10, 6  ;;  %s2207_s7 = sshll.u32 %s2655_s21, 6 }
  0x43   : > { %s3435_s13 = scalar_lea.vmem [#allocation10], %s1972_s26  ;;  %s1840_s30 = scalar_lea.hbm %s3497_s5, %s2207_s7 }
  0x44   : > { %512 = vmatpush.bf16.msra.mxu0 %v2040_v22  ;;  %s1841_s6 = sshll.u32 %s3435_s13, 4  ;;  %s1843_s9 = sshll.u32 %s1840_s30, 4  ;;  %s1842_s6 = int_to_ptr.vmem [resolvable:$true] %s1841_s6  ;;  %s1844_s9 = int_to_ptr.hbm [resolvable:$true] %s1843_s9 }
  0x45   : > { %2211 = vmatpush.bf16.msra.mxu1 %v2044_v23  ;;  %s1827_s12 = scalar_lea.sflag [#allocation4], %s2830_s10  ;;  %s2587_s21 = sshra.s32 %s1844_s9, 4  ;;  %s2588_s21 = int_to_ptr.hbm [resolvable:$true] %s2587_s21 }
  0x46   : > { %s2589_s17 = scalar_lea.hbm %s2588_s21, 64  ;;  %p2594_p10 = scmp.lt.s32.totalorder %s2588_s21, %s3497_s5 }
  0x47   : > { %p2590_p1 = scmp.ne.s32.totalorder %s2588_s21, %s2589_s17 }
  0x48   : > { %513 = vmatpush.bf16.msra.mxu0 %v2028_v28 }
  0x49   : > { %2212 = vmatpush.bf16.msra.mxu1 %v2032_v29  ;;  %p2591_p4 = pnand %p2590_p1, %p2799_p3 }
  0x4b   : > { %p2592_p8 = pneg %p2591_p4 }
  0x4c   : > { %514 = vmatpush.bf16.msra.mxu0 %v2016_v34 }
  0x4d   : > { %2213 = vmatpush.bf16.msra.mxu1 %v2020_v35 }
  0x50   : > { %515 = vmatpush.bf16.msra.mxu0 %v2004_v40 }
  0x51   : > { %2214 = vmatpush.bf16.msra.mxu1 %v2008_v41 }
  0x54   : > { %516 = vmatpush.bf16.msra.mxu0 %v1992_v46 }
  0x55   : > { %2215 = vmatpush.bf16.msra.mxu1 %v1996_v47 }
  0x57   : > { %517 = vmatmul.bf16.vlgmr.msra.gmra.mxu0 %v2849_v48 }
  0x58   : > { %538 = vmatpush.bf16.msrb.mxu0 %v2080_v7  ;;  %551 = vmatmul.bf16.vlgmr.msra.gmra.mxu1 %v2852_v49 }
  0x5c   : > { %539 = vmatpush.bf16.msrb.mxu0 %v2068_v11 }
  0x60   : > { %540 = vmatpush.bf16.msrb.mxu0 %v2056_v17 }
  0x64   : > { %541 = vmatpush.bf16.msrb.mxu0 %v2044_v23 }
  0x67   : > { %522 = vmatmul.bf16.gmra.mxu0 %v2852_v49 }
  0x68   : > { %542 = vmatpush.bf16.msrb.mxu0 %v2032_v29  ;;  %556 = vmatmul.bf16.gmra.mxu1 %v2857_v50 }
  0x6c   : > { %543 = vmatpush.bf16.msrb.mxu0 %v2020_v35 }
  0x70   : > { %544 = vmatpush.bf16.msrb.mxu0 %v2008_v41 }
  0x74   : > { %545 = vmatpush.bf16.msrb.mxu0 %v1996_v47 }
  0x77   : > { %527 = vmatmul.bf16.gmra.mxu0 %v2857_v50 }
  0x78   : > { %561 = vmatmul.bf16.gmra.mxu1 %v2862_v51 }
  0x87   : > { %532 = vmatmul.bf16.gmra.mxu0 %v2862_v51 }
  0x97   : > { %546 = vmatmul.bf16.vlgmr.msrb.gmra.mxu0 %v2849_v48 }
  0xd4   : > { %v518_v53 = vpop.f32.mrf.mxu0 }
  0xd5   : > { %v552_v55 = vpop.f32.mrf.mxu1  ;;  %v519_v43 = vadd.f32 %v518_v53, %v351_v24 }
  0xd6   : > { %v553_v56 = vadd.f32 %v552_v55, %v352_v54 }
  0xd7   : > { %v596_v55 = vpack.c.bf16 %v519_v43, %v519_v43 }
  0xd8   : > { %v606_v57 = vpack.c.bf16 %v553_v56, %v553_v56 }
  0xda   : > { %v666_v61 = vunpack.c.l.b16 %v606_v57 }
  0xdc   : > { %v520_v58 = vpop.f32.mrf.mxu0 }
  0xdd   : > { %v554_v59 = vpop.f32.mrf.mxu1  ;;  %v521_v41 = vadd.f32 %v520_v58, %v351_v24 }
  0xde   : > { %v555_v60 = vadd.f32 %v554_v59, %v352_v54  ;;  %v644_v59 = vunpack.c.l.b16 %v596_v55 }
  0xdf   : > { %v597_v46 = vpack.c.bf16 %v521_v41, %v521_v41 }
  0xe0   : > { %v607_v62 = vpack.c.bf16 %v555_v60, %v555_v60 }
  0xe1   : > { %v645_v57 = vunpack.c.l.b16 %v597_v46 }
  0xe2   : > { %v667_v63 = vunpack.c.l.b16 %v607_v62 }
  0xe3   : > { %v2900_v60 = vpack.c.b16 %v645_v57, %v644_v59 }
  0xe4   : > { %v2871_v0 = vpack.c.b16 %v667_v63, %v666_v61  ;;  %v2873_v1 = vpop.f32.mrf.mxu0 }
  0xe5   : > { %v557_v2 = vpop.f32.mrf.mxu1 }
  0xe6   : > { %910 = vrot.lane.b32.xlu1 %v2871_v0, %s2672_s1  ;;  %v558_v11 = vadd.f32 %v557_v2, %v352_v54  ;;  %v693_v36 = vsel %vm676_vm0, %v2871_v0, 0 }
  0xe8   : > { %v608_v16 = vpack.c.bf16 %v558_v11, %v558_v11 }
  0xea   : > { %v668_v21 = vunpack.c.l.b16 %v608_v16 }
  0xec   : > { %v525_v3 = vpop.f32.mrf.mxu0 }
  0xed   : > { %v559_v4 = vpop.f32.mrf.mxu1  ;;  %v526_v53 = vadd.f32 %v525_v3, %v351_v24 }
  0xee   : > { %v560_v12 = vadd.f32 %v559_v4, %v352_v54 }
  0xef   : > { %v599_v58 = vpack.c.bf16 %v526_v53, %v526_v53 }
  0xf0   : > { %v609_v17 = vpack.c.bf16 %v560_v12, %v560_v12 }
  0xf1   : > { %v647_v62 = vunpack.c.l.b16 %v599_v58 }
  0xf2   : > { %v669_v22 = vunpack.c.l.b16 %v609_v17  ;;  %v2059_v17 = vld [vmem:[#allocation5 + $0x80] sm:$0xf] }
  0xf4   : > { %v2877_v5 = vpop.f32.mrf.mxu0  ;;  %v2886_v26 = vpack.c.b16 %v669_v22, %v668_v21 }
  0xf5   : > { %v562_v6 = vpop.f32.mrf.mxu1 }
  0xf6   : > { %v563_v7 = vadd.f32 %v562_v6, %v352_v54  ;;  %v696_v30 = vsel %vm676_vm0, %v2886_v26, 0  ;;  %v529_v6 = vadd.f32 %v2877_v5, %v351_v24  ;;  %v2071_v5 = vld [vmem:[#allocation5 + $0x98] sm:$0xf] }
  0xf8   : > { %v610_v8 = vpack.c.bf16 %v563_v7, %v563_v7 }
  0xfa   : > { %v670_v14 = vunpack.c.l.b16 %v610_v8  ;;  %v600_v8 = vpack.c.bf16 %v529_v6, %v529_v6 }
  0xfc   : > { %v530_v9 = vpop.f32.mrf.mxu0  ;;  %v648_v11 = vunpack.c.l.b16 %v600_v8 }
  0xfd   : > { %v564_v10 = vpop.f32.mrf.mxu1  ;;  %v531_v4 = vadd.f32 %v530_v9, %v351_v24  ;;  %v2198_v9 = vld [vmem:[#allocation5 + $0xb8] sm:$0xf0] }
  0xfe   : > { %v565_v13 = vadd.f32 %v564_v10, %v352_v54 }
  0xff   : > { %v601_v7 = vpack.c.bf16 %v531_v4, %v531_v4 }
 0x100   : > { %v611_v15 = vpack.c.bf16 %v565_v13, %v565_v13  ;;  %v2083_v13 = vld [vmem:[#allocation5 + $0xb0] sm:$0xf] }
 0x101   : > { %v649_v10 = vunpack.c.l.b16 %v601_v7 }
 0x102   : > { %v671_v18 = vunpack.c.l.b16 %v611_v15  ;;  %v2195_v15 = vld [vmem:[#allocation5 + $0xa0] sm:$0xf0] }
 0x103   : > { %v2910_v12 = vpack.c.b16 %v649_v10, %v648_v11  ;;  %v2072_v16 = vor.u32 %v2195_v15, %v2071_v5 }
 0x104   : > { %v2879_v19 = vpack.c.b16 %v671_v18, %v670_v14  ;;  %v533_v20 = vpop.f32.mrf.mxu0  ;;  %v2084_v14 = vor.u32 %v2198_v9, %v2083_v13  ;;  %v2192_v18 = vld [vmem:[#allocation5 + $0x88] sm:$0xf0] }
 0x105   : > { %v534_v25 = vadd.f32 %v533_v20, %v351_v24  ;;  %v2060_v21 = vor.u32 %v2192_v18, %v2059_v17 }
 0x106   : > { %914 = vrot.lane.b32.xlu2 %v2879_v19, %s2672_s1  ;;  %v699_v23 = vsel %vm676_vm0, %v2879_v19, 0  ;;  %567 = vmatpush.bf16.msra.mxu2 %v2084_v14 }
 0x107   : > { %705 = vmatpush.bf16.xpose.msra.mxu3 %v699_v23  ;;  %v602_v28 = vpack.c.bf16 %v534_v25, %v534_v25  ;;  %v2047_v23 = vld [vmem:[#allocation5 + $0x68] sm:$0xf] }
 0x109   : > { %v650_v32 = vunpack.c.l.b16 %v602_v28  ;;  %v2035_v28 = vld [vmem:[#allocation5 + $0x50] sm:$0xf] }
 0x10a   : > { %568 = vmatpush.bf16.msra.mxu2 %v2072_v16 }
 0x10c   : > { %v535_v27 = vpop.f32.mrf.mxu0 }
 0x10d   : > { %v536_v29 = vadd.f32 %v535_v27, %v351_v24 }
 0x10e   : > { %569 = vmatpush.bf16.msra.mxu2 %v2060_v21 }
 0x10f   : > { %v603_v31 = vpack.c.bf16 %v536_v29, %v536_v29  ;;  %706 = vmatpush.bf16.xpose.msra.mxu3 %v696_v30  ;;  %v2186_v29 = vld [vmem:[#allocation5 + $0x58] sm:$0xf0] }
 0x111   : > { %v651_v33 = vunpack.c.l.b16 %v603_v31  ;;  %v2036_v31 = vor.u32 %v2186_v29, %v2035_v28 }
 0x113   : > { %v2890_v34 = vpack.c.b16 %v651_v33, %v650_v32  ;;  %v2023_v33 = vld [vmem:[#allocation5 + $0x38] sm:$0xf] }
 0x114   : > { %v547_v35 = vpop.f32.mrf.mxu0 }
 0x115   : > { %v548_v37 = vadd.f32 %v547_v35, %v352_v54  ;;  %v2183_v35 = vld [vmem:[#allocation5 + $0x40] sm:$0xf0] }
 0x117   : > { %707 = vmatpush.bf16.xpose.msra.mxu3 %v693_v36  ;;  %v604_v39 = vpack.c.bf16 %v548_v37, %v548_v37  ;;  %v2024_v36 = vor.u32 %v2183_v35, %v2023_v33 }
 0x119   : > { %v664_v44 = vunpack.c.l.b16 %v604_v39  ;;  %v2180_v39 = vld [vmem:[#allocation5 + $0x28] sm:$0xf0] }
 0x11c   : > { %v549_v38 = vpop.f32.mrf.mxu0 }
 0x11d   : > { %v550_v40 = vadd.f32 %v549_v38, %v352_v54  ;;  %v524_v54 = vadd.f32 %v2873_v1, %v351_v24  ;;  %v2189_v24 = vld [vmem:[#allocation5 + $0x70] sm:$0xf0]  ;;  %v2011_v38 = vld [vmem:[#allocation5 + $0x20] sm:$0xf] }
 0x11e   : > { %v2048_v25 = vor.u32 %v2189_v24, %v2047_v23  ;;  %v2012_v41 = vor.u32 %v2180_v39, %v2011_v38  ;;  %v353_v39 = vperm.slane %v2868_v52, 2 }
 0x11f   : > { %v605_v42 = vpack.c.bf16 %v550_v40, %v550_v40  ;;  %v598_v61 = vpack.c.bf16 %v524_v54, %v524_v54 }
 0x120   : > { %570 = vmatpush.bf16.msra.mxu2 %v2048_v25 }
 0x121   : > { %v665_v45 = vunpack.c.l.b16 %v605_v42  ;;  %v646_v63 = vunpack.c.l.b16 %v598_v61 }
 0x123   : > { %v2894_v47 = vpack.c.b16 %v665_v45, %v664_v44  ;;  %v2905_v2 = vpack.c.b16 %v647_v62, %v646_v63  ;;  %v1999_v44 = vld [vmem:[#allocation5 + $0x8] sm:$0xf]  ;;  %v2177_v45 = vld [vmem:[#allocation5 + $0x10] sm:$0xf0] }
 0x124   : > { %571 = vmatpush.bf16.msra.mxu2 %v2036_v31  ;;  %v2000_v46 = vor.u32 %v2177_v45, %v1999_v44 }
 0x125   : > { %908 = vrot.lane.b32.xlu1 %v2894_v47, %s2672_s1  ;;  %v690_v56 = vsel %vm676_vm0, %v2894_v47, 0 }
 0x126   : > { %708 = vmatpush.bf16.xpose.msra.mxu3 %v690_v56 }
 0x128   : > { %572 = vmatpush.bf16.msra.mxu2 %v2024_v36 }
 0x12c   : > { %573 = vmatpush.bf16.msra.mxu2 %v2012_v41 }
 0x12d   : > { %2085 = vmatmul.msk.bf16.vlgmr.msra.gmra.mxu3 %vm676_vm0, %v2900_v60 }
 0x130   : > { %574 = vmatpush.bf16.msra.mxu2 %v2000_v46 }
 0x133   : > { %575 = vmatmul.bf16.vlgmr.msra.gmra.mxu2 %v2849_v48 }
 0x13d   : > { %2086 = vmatmul.msk.bf16.gmra.mxu3 %vm676_vm0, %v2905_v2 }
 0x143   : > { %580 = vmatmul.bf16.gmra.mxu2 %v2852_v49 }
 0x14d   : > { %2087 = vmatmul.msk.bf16.gmra.mxu3 %vm676_vm0, %v2910_v12 }
 0x153   : > { %585 = vmatmul.bf16.gmra.mxu2 %v2857_v50 }
 0x158   : > { %v911_v7 = vpop.permute.xlu1 %910 }
 0x159   : > { %v932_v29 = vsel %vm676_vm0, %v911_v7, 0 }
 0x15d   : > { %2088 = vmatmul.msk.bf16.gmra.mxu3 %vm676_vm0, %v2890_v34 }
 0x160   : > { %v915_v1 = vpop.permute.xlu2 %914 }
 0x161   : > { %v938_v3 = vsel %vm676_vm0, %v915_v1, 0 }
 0x162   : > { %944 = vmatpush.bf16.xpose.msrb.mxu1 %v938_v3 }
 0x163   : > { %590 = vmatmul.bf16.gmra.mxu2 %v2862_v51 }
 0x197   : > { %v909_v51 = vpop.permute.xlu1 %908 }
 0x1b0   : > { %v710_v20 = vpop.f32.mrf.mxu3 }
 0x1b1   : > { %v730_v22 = vmul.f32 0.17677669, %v710_v20 }
 0x1b3   : > { %v739_v27 = vsel %vm738_vm1, %v730_v22, -inf }
 0x1b4   : > { %740 = vmax.xlane.f32.xlu0 %v739_v27 }
 0x1b6   : > { %v576_v31 = vpop.f32.mrf.mxu2 }
 0x1b8   : > { %v712_v30 = vpop.f32.mrf.mxu3 }
 0x1b9   : > { %v731_v32 = vmul.f32 0.17677669, %v712_v30 }
 0x1bb   : > { %v742_v37 = vsel %vm738_vm1, %v731_v32, -inf }
 0x1bc   : > { %743 = vmax.xlane.f32.xlu0 %v742_v37 }
 0x1be   : > { %v578_v33 = vpop.f32.mrf.mxu2 }
 0x1c0   : > { %v715_v40 = vpop.f32.mrf.mxu3 }
 0x1c1   : > { %v732_v42 = vmul.f32 0.17677669, %v715_v40 }
 0x1c3   : > { %v745_v43 = vsel %vm738_vm1, %v732_v42, -inf }
 0x1c4   : > { %746 = vmax.xlane.f32.xlu1 %v745_v43 }
 0x1c6   : > { %v581_v36 = vpop.f32.mrf.mxu2 }
 0x1c8   : > { %v717_v55 = vpop.f32.mrf.mxu3 }
 0x1c9   : > { %v733_v56 = vmul.f32 0.17677669, %v717_v55 }
 0x1cb   : > { %v748_v57 = vsel %vm738_vm1, %v733_v56, -inf }
 0x1cc   : > { %749 = vmax.xlane.f32.xlu1 %v748_v57  ;;  %v579_v57 = vadd.f32 %v578_v33, %v353_v39 }
 0x1ce   : > { %v583_v37 = vpop.f32.mrf.mxu2 }
 0x1cf   : > { %v584_v52 = vadd.f32 %v583_v37, %v353_v39 }
 0x1d0   : > { %912 = vrot.lane.b32.xlu0 %v2886_v26, %s2672_s1  ;;  %v720_v59 = vpop.f32.mrf.mxu3 }
 0x1d1   : > { %v2932_v48 = vmul.f32 0.17677669, %v720_v59 }
 0x1d3   : > { %v751_v62 = vsel %vm738_vm1, %v2932_v48, -inf }
 0x1d6   : > { %v586_v38 = vpop.f32.mrf.mxu2 }
 0x1d8   : > { %v722_v53 = vpop.f32.mrf.mxu3 }
 0x1d9   : > { %v2941_v6 = vmul.f32 0.17677669, %v722_v53  ;;  %v615_v53 = vpack.c.bf16 %v584_v52, %v584_v52 }
 0x1db   : > { %v754_v50 = vsel %vm738_vm1, %v2941_v6, -inf }
 0x1e0   : > { %v725_v54 = vpop.f32.mrf.mxu3 }
 0x1e1   : > { %v2925_v58 = vmul.f32 0.17677669, %v725_v54 }
 0x1e3   : > { %v757_v61 = vsel %vm738_vm1, %v2925_v58, -inf }
 0x1e4   : > { %758 = vmax.xlane.f32.xlu2 %v757_v61 }
 0x1e5   : > { %900 = vrot.lane.b32.xlu1 %v2900_v60, %s2672_s1 }
 0x1e8   : > { %v727_v49 = vpop.f32.mrf.mxu3 }
 0x1e9   : > { %v2937_v63 = vmul.f32 0.17677669, %v727_v49 }
 0x1eb   : > { %v760_v4 = vsel %vm738_vm1, %v2937_v63, -inf }
 0x1fa   : > { %752 = vmax.xlane.f32.xlu0 %v751_v62 }
 0x202   : > { %761 = vmax.xlane.f32.xlu0 %v760_v4 }
 0x20f   : > { %755 = vmax.xlane.f32.xlu1 %v754_v50  ;;  %v613_v50 = vpack.c.bf16 %v579_v57, %v579_v57 }
 0x227   : > { %v741_v8 = vpop.xlane.xlu0 %740 }
 0x228   : > { %v763_v10 = vsub.f32 %v730_v22, %v741_v8 }
 0x22a   : > { %v771_v11 = vmul.f32 1.442695, %v763_v10 }
 0x22c   : > { %2325 = vpow2.f32 %v771_v11  ;;  %v840_v11 = vunpack.c.l.b16 %v613_v50 }
 0x22f   : > { %v744_v1 = vpop.xlane.xlu0 %743 }
 0x230   : > { %v764_v3 = vsub.f32 %v731_v32, %v744_v1  ;;  %v929_v32 = vsel %vm676_vm0, %v909_v51, 0 }
 0x232   : > { %v2945_v13 = vpop.eup %2325  ;;  %v773_v9 = vmul.f32 1.442695, %v764_v3 }
 0x233   : > { %v787_v14 = vsel %vm738_vm1, %v2945_v13, 0.0 }
 0x234   : > { %2327 = vpow2.f32 %v773_v9  ;;  %788 = vadd.xlane.f32.xlu2 %v787_v14 }
 0x237   : > { %v747_v5 = vpop.xlane.xlu1 %746 }
 0x238   : > { %v765_v15 = vsub.f32 %v732_v42, %v747_v5  ;;  %v582_v42 = vadd.f32 %v581_v36, %v353_v39 }
 0x23a   : > { %v2949_v16 = vpop.eup %2327  ;;  %v775_v17 = vmul.f32 1.442695, %v765_v15  ;;  %v614_v59 = vpack.c.bf16 %v582_v42, %v582_v42 }
 0x23b   : > { %v790_v18 = vsel %vm738_vm1, %v2949_v16, 0.0 }
 0x23c   : > { %2329 = vpow2.f32 %v775_v17  ;;  %791 = vadd.xlane.f32.xlu2 %v790_v18  ;;  %v841_v7 = vunpack.c.l.b16 %v614_v59 }
 0x23f   : > { %v750_v20 = vpop.xlane.xlu1 %749 }
 0x240   : > { %v766_v21 = vsub.f32 %v733_v56, %v750_v20  ;;  %v577_v56 = vadd.f32 %v576_v31, %v353_v39 }
 0x242   : > { %v2953_v22 = vpop.eup %2329  ;;  %v777_v23 = vmul.f32 1.442695, %v766_v21  ;;  %v913_v24 = vpop.permute.xlu0 %912  ;;  %v612_v4 = vpack.c.bf16 %v577_v56, %v577_v56 }
 0x243   : > { %v935_v25 = vsel %vm676_vm0, %v913_v24, 0  ;;  %v793_v27 = vsel %vm738_vm1, %v2953_v22, 0.0 }
 0x244   : > { %2331 = vpow2.f32 %v777_v23  ;;  %945 = vmatpush.bf16.xpose.msrb.mxu1 %v935_v25  ;;  %794 = vadd.xlane.f32.xlu0 %v793_v27  ;;  %v839_v10 = vunpack.c.l.b16 %v612_v4 }
 0x246   : > { %v3009_v14 = vpack.c.b16 %v840_v11, %v839_v10 }
 0x24a   : > { %v2958_v28 = vpop.eup %2331 }
 0x24b   : > { %v796_v30 = vsel %vm738_vm1, %v2958_v28, 0.0 }
 0x24c   : > { %946 = vmatpush.bf16.xpose.msrb.mxu1 %v932_v29  ;;  %797 = vadd.xlane.f32.xlu1 %v796_v30 }
 0x254   : > { %947 = vmatpush.bf16.xpose.msrb.mxu1 %v929_v32  ;;  %904 = vrot.lane.b32.xlu2 %v2910_v12, %s2672_s1 }
 0x257   : > { %v901_v35 = vpop.permute.xlu1 %900  ;;  %v759_v3 = vpop.xlane.xlu2 %758 }
 0x258   : > { %906 = vrot.lane.b32.xlu0 %v2890_v34, %s2672_s1  ;;  %v769_v5 = vsub.f32 %v2925_v58, %v759_v3 }
 0x25a   : > { %v783_v20 = vmul.f32 1.442695, %v769_v5 }
 0x25b   : > { %2093 = vmatmul.msk.bf16.vlgmr.msrb.gmra.mxu1 %vm676_vm0, %v901_v35 }
 0x25c   : > { %1246 = vrot.lane.b32.xlu2 %v2879_v19, %s2673_s2 }
 0x260   : > { %1531 = vrot.lane.b32.xlu0 %v2886_v26, %s2674_s3 }
 0x264   : > { %1244 = vrot.lane.b32.xlu2 %v2886_v26, %s2673_s2  ;;  %v588_v26 = vpop.f32.mrf.mxu2 }
 0x265   : > { %902 = vrot.lane.b32.xlu1 %v2905_v2, %s2672_s1  ;;  %v589_v40 = vadd.f32 %v588_v26, %v353_v39 }
 0x267   : > { %v617_v45 = vpack.c.bf16 %v589_v40, %v589_v40 }
 0x268   : > { %1529 = vrot.lane.b32.xlu0 %v2871_v0, %s2674_s3 }
 0x269   : > { %v844_v61 = vunpack.c.l.b16 %v617_v45 }
 0x26c   : > { %1242 = vrot.lane.b32.xlu2 %v2871_v0, %s2673_s2  ;;  %v591_v0 = vpop.f32.mrf.mxu2 }
 0x26d   : > { %1533 = vrot.lane.b32.xlu1 %v2879_v19, %s2674_s3  ;;  %v592_v19 = vadd.f32 %v591_v0, %v353_v39  ;;  %v753_v1 = vpop.xlane.xlu0 %752 }
 0x26e   : > { %v767_v9 = vsub.f32 %v2932_v48, %v753_v1 }
 0x26f   : > { %v618_v41 = vpack.c.bf16 %v592_v19, %v592_v19  ;;  %v3035_v19 = vld [vmem:[#allocation8 + $0x8] sm:$0xff] }
 0x270   : > { %1527 = vrot.lane.b32.xlu0 %v2894_v47, %s2674_s3  ;;  %v779_v17 = vmul.f32 1.442695, %v767_v9 }
 0x271   : > { %v845_v46 = vunpack.c.l.b16 %v618_v41  ;;  %v3038_v41 = vld [vmem:[#allocation8] sm:$0xff] }
 0x272   : > { %2333 = vpow2.f32 %v779_v17 }
 0x273   : > { %2335 = vpow2.f32 %v783_v20 }
 0x274   : > { %1240 = vrot.lane.b32.xlu2 %v2894_v47, %s2673_s2  ;;  %v587_v47 = vadd.f32 %v586_v38, %v353_v39  ;;  %v593_v43 = vpop.f32.mrf.mxu2 }
 0x275   : > { %1519 = vrot.lane.b32.xlu1 %v2900_v60, %s2674_s3  ;;  %v762_v21 = vpop.xlane.xlu0 %761 }
 0x276   : > { %v616_v44 = vpack.c.bf16 %v587_v47, %v587_v47  ;;  %v770_v24 = vsub.f32 %v2937_v63, %v762_v21 }
 0x278   : > { %1521 = vrot.lane.b32.xlu0 %v2905_v2, %s2674_s3  ;;  %v843_v54 = vunpack.c.l.b16 %v616_v44  ;;  %v3016_v48 = vpop.eup %2333  ;;  %v785_v25 = vmul.f32 1.442695, %v770_v24 }
 0x279   : > { %v3018_v27 = vpop.eup %2335  ;;  %v799_v58 = vsel %vm738_vm1, %v3016_v48, 0.0 }
 0x27a   : > { %v3002_v8 = vpack.c.b16 %v844_v61, %v843_v54  ;;  %v805_v30 = vsel %vm738_vm1, %v3018_v27, 0.0 }
 0x27c   : > { %1232 = vrot.lane.b32.xlu2 %v2900_v60, %s2673_s2  ;;  %v594_v60 = vadd.f32 %v593_v43, %v353_v39 }
 0x27d   : > { %1236 = vrot.lane.b32.xlu1 %v2910_v12, %s2673_s2 }
 0x27e   : > { %v619_v55 = vpack.c.bf16 %v594_v60, %v594_v60 }
 0x280   : > { %1238 = vrot.lane.b32.xlu0 %v2890_v34, %s2673_s2  ;;  %v846_v62 = vunpack.c.l.b16 %v619_v55 }
 0x282   : > { %v3000_v49 = vpack.c.b16 %v846_v62, %v845_v46  ;;  %v756_v15 = vpop.xlane.xlu1 %755 }
 0x283   : > { %v768_v18 = vsub.f32 %v2941_v6, %v756_v15 }
 0x284   : > { %1234 = vrot.lane.b32.xlu2 %v2905_v2, %s2673_s2  ;;  %v842_v2 = vunpack.c.l.b16 %v615_v53  ;;  %871 = vmatpush.bf16.msra.mxu0 %v3000_v49 }
 0x285   : > { %v781_v23 = vmul.f32 1.442695, %v768_v18 }
 0x286   : > { %v3005_v51 = vpack.c.b16 %v842_v2, %v841_v7 }
 0x287   : > { %2337 = vpow2.f32 %v781_v23 }
 0x288   : > { %872 = vmatpush.bf16.msra.mxu0 %v3002_v8  ;;  %2339 = vpow2.f32 %v785_v25 }
 0x28c   : > { %873 = vmatpush.bf16.msra.mxu0 %v3005_v51 }
 0x28d   : > { %v3022_v6 = vpop.eup %2337 }
 0x28e   : > { %v802_v63 = vsel %vm738_vm1, %v3022_v6, 0.0  ;;  %v3028_v31 = vpop.eup %2339 }
 0x28f   : > { %v808_v33 = vsel %vm738_vm1, %v3028_v31, 0.0 }
 0x290   : > { %874 = vmatpush.bf16.msra.mxu0 %v3009_v14 }
 0x294   : > { %1209 = vmatpush.bf16.msrb.mxu0 %v3035_v19 }
 0x298   : > { %1210 = vmatpush.bf16.msrb.mxu0 %v3038_v41 }
 0x2a7   : > { %800 = vadd.xlane.f32.xlu1 %v799_v58  ;;  %v789_v29 = vpop.xlane.xlu2 %788 }
 0x2a8   : > { %2341 = vrcp.f32 %v789_v29 }
 0x2aa   : > { %806 = vadd.xlane.f32.xlu0 %v805_v30 }
 0x2ad   : > { %803 = vadd.xlane.f32.xlu2 %v802_v63 }
 0x2ae   : > { %v2342_v35 = vpop.eup %2341 }
 0x2af   : > { %v792_v32 = vpop.xlane.xlu2 %791  ;;  %v819_v37 = vmul.f32 %v2342_v35, %v2945_v13 }
 0x2b0   : > { %2343 = vrcp.f32 %v792_v32 }
 0x2b2   : > { %809 = vadd.xlane.f32.xlu0 %v808_v33 }
 0x2b6   : > { %v2344_v36 = vpop.eup %2343 }
 0x2b7   : > { %v820_v38 = vmul.f32 %v2344_v36, %v2949_v16  ;;  %v905_v26 = vpop.permute.xlu2 %904  ;;  %v795_v0 = vpop.xlane.xlu0 %794 }
 0x2b8   : > { %2345 = vrcp.f32 %v795_v0 }
 0x2b9   : > { %v827_v39 = vpack.c.bf16 %v820_v38, %v819_v37 }
 0x2bb   : > { %2089 = vmatmul.msk.bf16.vlgmr.msra.gmra.mxu0 %vm738_vm1, %v827_v39 }
 0x2be   : > { %v2346_v13 = vpop.eup %2345 }
 0x2bf   : > { %v798_v47 = vpop.xlane.xlu1 %797  ;;  %v1247_v40 = vpop.permute.xlu2 %1246  ;;  %v821_v52 = vmul.f32 %v2346_v13, %v2953_v22 }
 0x2c0   : > { %2347 = vrcp.f32 %v798_v47  ;;  %v1270_v42 = vsel %vm676_vm0, %v1247_v40, 0  ;;  %1525 = vrot.lane.b32.xlu1 %v2890_v34, %s2674_s3 }
 0x2c1   : > { %1276 = vmatpush.bf16.xpose.msra.mxu1 %v1270_v42 }
 0x2c5   : > { %1523 = vrot.lane.b32.xlu2 %v2910_v12, %s2674_s3 }
 0x2c6   : > { %v2348_v16 = vpop.eup %2347 }
 0x2c7   : > { %v1245_v43 = vpop.permute.xlu2 %1244  ;;  %v822_v44 = vmul.f32 %v2348_v16, %v2958_v28 }
 0x2c8   : > { %v1267_v45 = vsel %vm676_vm0, %v1245_v43, 0 }
 0x2c9   : > { %1277 = vmatpush.bf16.xpose.msra.mxu1 %v1267_v45  ;;  %v828_v60 = vpack.c.bf16 %v822_v44, %v821_v52 }
 0x2ca   : > { %v907_v55 = vpop.permute.xlu0 %906 }
 0x2cb   : > { %2090 = vmatmul.msk.bf16.gmra.mxu0 %vm738_vm1, %v828_v60 }
 0x2cf   : > { %v1243_v34 = vpop.permute.xlu2 %1242 }
 0x2d0   : > { %v1264_v46 = vsel %vm676_vm0, %v1243_v34, 0 }
 0x2d1   : > { %1278 = vmatpush.bf16.xpose.msra.mxu1 %v1264_v46 }
 0x2d2   : > { %v1532_v54 = vpop.permute.xlu0 %1531 }
 0x2d3   : > { %v1554_v4 = vsel %vm676_vm0, %v1532_v54, 0 }
 0x2d7   : > { %v903_v56 = vpop.permute.xlu1 %902  ;;  %v1241_v57 = vpop.permute.xlu2 %1240 }
 0x2d8   : > { %v1261_v12 = vsel %vm676_vm0, %v1241_v57, 0  ;;  %v949_v59 = vpop.f32.mrf.mxu1  ;;  %2094 = vmatmul.msk.bf16.gmra.mxu1 %vm676_vm0, %v903_v56 }
 0x2d9   : > { %1279 = vmatpush.bf16.xpose.msra.mxu1 %v1261_v12  ;;  %v3060_v50 = vmul.f32 0.17677669, %v949_v59 }
 0x2da   : > { %v1530_v7 = vpop.permute.xlu0 %1529 }
 0x2db   : > { %v977_v2 = vsel %vm738_vm1, %v3060_v50, -inf  ;;  %v1551_v10 = vsel %vm676_vm0, %v1530_v7, 0 }
 0x2df   : > { %v1534_v22 = vpop.permute.xlu1 %1533  ;;  %v1233_v3 = vpop.permute.xlu2 %1232 }
 0x2e0   : > { %v1557_v28 = vsel %vm676_vm0, %v1534_v22, 0  ;;  %v951_v53 = vpop.f32.mrf.mxu1 }
 0x2e1   : > { %v3054_v61 = vmul.f32 0.17677669, %v951_v53  ;;  %1563 = vmatpush.bf16.xpose.msra.mxu0 %v1557_v28 }
 0x2e2   : > { %v1528_v11 = vpop.permute.xlu0 %1527 }
 0x2e3   : > { %v980_v62 = vsel %vm738_vm1, %v3054_v61, -inf  ;;  %v1548_v1 = vsel %vm676_vm0, %v1528_v11, 0 }
 0x2e4   : > { %981 = vmax.xlane.f32.xlu0 %v980_v62 }
 0x2e7   : > { %v1520_v9 = vpop.permute.xlu1 %1519  ;;  %v1235_v17 = vpop.permute.xlu2 %1234 }
 0x2e8   : > { %2095 = vmatmul.msk.bf16.gmra.mxu1 %vm676_vm0, %v905_v26 }
 0x2e9   : > { %1564 = vmatpush.bf16.xpose.msra.mxu0 %v1554_v4 }
 0x2ea   : > { %v1522_v5 = vpop.permute.xlu0 %1521 }
 0x2ee   : > { %978 = vmax.xlane.f32.xlu2 %v977_v2 }
 0x2ef   : > { %v1237_v15 = vpop.permute.xlu1 %1236 }
 0x2f1   : > { %1565 = vmatpush.bf16.xpose.msra.mxu0 %v1551_v10 }
 0x2f2   : > { %v1239_v18 = vpop.permute.xlu0 %1238 }
 0x2f8   : > { %2096 = vmatmul.msk.bf16.gmra.mxu1 %vm676_vm0, %v907_v55 }
 0x2f9   : > { %1566 = vmatpush.bf16.xpose.msra.mxu0 %v1548_v1 }
 0x308   : > { %2125 = vmatmul.msk.bf16.vlgmr.msra.gmra.mxu1 %vm676_vm0, %v1233_v3 }
 0x318   : > { %2126 = vmatmul.msk.bf16.gmra.mxu1 %vm676_vm0, %v1235_v17 }
 0x31a   : > { %v801_v20 = vpop.xlane.xlu1 %800 }
 0x31b   : > { %2349 = vrcp.f32 %v801_v20 }
 0x31d   : > { %v807_v21 = vpop.xlane.xlu0 %806 }
 0x320   : > { %v804_v23 = vpop.xlane.xlu2 %803 }
 0x321   : > { %2351 = vrcp.f32 %v804_v23  ;;  %v2350_v24 = vpop.eup %2349 }
 0x322   : > { %v823_v58 = vmul.f32 %v2350_v24, %v3016_v48 }
 0x325   : > { %v810_v30 = vpop.xlane.xlu0 %809 }
 0x326   : > { %2353 = vrcp.f32 %v810_v30 }
 0x327   : > { %v2352_v25 = vpop.eup %2351  ;;  %2355 = vrcp.f32 %v807_v21 }
 0x328   : > { %2127 = vmatmul.msk.bf16.gmra.mxu1 %vm676_vm0, %v1237_v15  ;;  %v824_v29 = vmul.f32 %v2352_v25, %v3022_v6  ;;  %v1524_v22 = vpop.permute.xlu2 %1523 }
 0x32a   : > { %v829_v63 = vpack.c.bf16 %v824_v29, %v823_v58 }
 0x32c   : > { %2091 = vmatmul.msk.bf16.gmra.mxu0 %vm738_vm1, %v829_v63  ;;  %v2354_v32 = vpop.eup %2353 }
 0x32d   : > { %v2356_v33 = vpop.eup %2355  ;;  %v826_v35 = vmul.f32 %v2354_v32, %v3028_v31 }
 0x32e   : > { %v825_v36 = vmul.f32 %v2356_v33, %v3018_v27 }
 0x330   : > { %v830_v38 = vpack.c.bf16 %v826_v35, %v825_v36 }
 0x332   : > { %v1526_v54 = vpop.permute.xlu1 %1525 }
 0x338   : > { %2128 = vmatmul.msk.bf16.gmra.mxu1 %vm676_vm0, %v1239_v18  ;;  %v876_v37 = vpop.f32.mrf.mxu0 }
 0x33c   : > { %2092 = vmatmul.msk.bf16.gmra.mxu0 %vm738_vm1, %v830_v38 }
 0x340   : > { %v878_v48 = vpop.f32.mrf.mxu0 }
 0x341   : > { %v896_v6 = vpack.c.bf16 %v878_v48, %v876_v37 }
 0x348   : > { %v881_v26 = vpop.f32.mrf.mxu0 }
 0x34c   : > { %2121 = vmatmul.msk.bf16.vlgmr.msrb.gmra.mxu0 %vm676_vm0, %v896_v6 }
 0x350   : > { %v883_v47 = vpop.f32.mrf.mxu0 }
 0x351   : > { %v897_v40 = vpack.c.bf16 %v883_v47, %v881_v26 }
 0x355   : > { %v954_v39 = vpop.f32.mrf.mxu1 }
 0x356   : > { %v3078_v0 = vmul.f32 0.17677669, %v954_v39 }
 0x357   : > { %v982_v24 = vpop.xlane.xlu0 %981 }
 0x358   : > { %v983_v31 = vsel %vm738_vm1, %v3078_v0, -inf  ;;  %v1002_v30 = vsub.f32 %v3054_v61, %v982_v24 }
 0x359   : > { %984 = vmax.xlane.f32.xlu1 %v983_v31 }
 0x35a   : > { %v1011_v33 = vmul.f32 1.442695, %v1002_v30 }
 0x35c   : > { %2122 = vmatmul.msk.bf16.gmra.mxu0 %vm676_vm0, %v897_v40  ;;  %2357 = vpow2.f32 %v1011_v33 }
 0x35d   : > { %v956_v27 = vpop.f32.mrf.mxu1 }
 0x35e   : > { %v3083_v42 = vmul.f32 0.17677669, %v956_v27 }
 0x360   : > { %v986_v13 = vsel %vm738_vm1, %v3083_v42, -inf }
 0x361   : > { %987 = vmax.xlane.f32.xlu2 %v986_v13  ;;  %v979_v36 = vpop.xlane.xlu2 %978 }
 0x362   : > { %v3159_v61 = vpop.eup %2357 }
 0x363   : > { %v1028_v47 = vsel %vm738_vm1, %v3159_v61, 0.0 }
 0x365   : > { %v959_v16 = vpop.f32.mrf.mxu1 }
 0x366   : > { %v3087_v43 = vmul.f32 0.17677669, %v959_v16 }
 0x368   : > { %v989_v52 = vsel %vm738_vm1, %v3087_v43, -inf }
 0x369   : > { %990 = vmax.xlane.f32.xlu0 %v989_v52 }
 0x36c   : > { %2145 = vmatmul.msk.bf16.vlgmr.msra.gmra.mxu0 %vm676_vm0, %v1520_v9 }
 0x36d   : > { %v961_v44 = vpop.f32.mrf.mxu1 }
 0x36e   : > { %v3092_v45 = vmul.f32 0.17677669, %v961_v44 }
 0x370   : > { %v992_v60 = vsel %vm738_vm1, %v3092_v45, -inf }
 0x371   : > { %993 = vmax.xlane.f32.xlu1 %v992_v60 }
 0x375   : > { %v964_v34 = vpop.f32.mrf.mxu1 }
 0x376   : > { %v3096_v46 = vmul.f32 0.17677669, %v964_v34 }
 0x378   : > { %v995_v55 = vsel %vm738_vm1, %v3096_v46, -inf }
 0x379   : > { %996 = vmax.xlane.f32.xlu2 %v995_v55 }
 0x37c   : > { %2146 = vmatmul.msk.bf16.gmra.mxu0 %vm676_vm0, %v1522_v5 }
 0x37d   : > { %v966_v56 = vpop.f32.mrf.mxu1 }
 0x37e   : > { %v3101_v57 = vmul.f32 0.17677669, %v966_v56 }
 0x380   : > { %v998_v12 = vsel %vm738_vm1, %v3101_v57, -inf }
 0x381   : > { %999 = vmax.xlane.f32.xlu0 %v998_v12 }
 0x385   : > { %v1281_v59 = vpop.f32.mrf.mxu1 }
 0x386   : > { %v3133_v15 = vmul.f32 0.17677669, %v1281_v59 }
 0x388   : > { %v1309_v20 = vsel %vm738_vm1, %v3133_v15, -inf }
 0x38a   : > { %1075 = vrot.lane.b32.xlu1 %v3000_v49, %s2672_s1 }
 0x38c   : > { %2147 = vmatmul.msk.bf16.gmra.mxu0 %vm676_vm0, %v1524_v22 }
 0x38d   : > { %v1283_v28 = vpop.f32.mrf.mxu1 }
 0x38e   : > { %v3125_v1 = vmul.f32 0.17677669, %v1283_v28 }
 0x390   : > { %v1312_v5 = vsel %vm738_vm1, %v3125_v1, -inf }
 0x391   : > { %1073 = vrot.lane.b32.xlu2 %v3002_v8, %s2672_s1 }
 0x392   : > { %1069 = vrot.lane.b32.xlu1 %v3009_v14, %s2672_s1 }
 0x395   : > { %v1286_v53 = vpop.f32.mrf.mxu1  ;;  %1071 = vrot.lane.b32.xlu0 %v3005_v51, %s2672_s1  ;;  %s2593_s1 = scalar_lea.hbm %s3497_s5, 128 }
 0x396   : > { %v3143_v25 = vmul.f32 0.17677669, %v1286_v53  ;;  %p2595_p12 = scmp.lt.s32.totalorder %s2593_s1, %s2589_s17 }
 0x398   : > { %v1315_v63 = vsel %vm738_vm1, %v3143_v25, -inf  ;;  %p2596_p13 = por %p2595_p12, %p2594_p10 }
 0x39a   : > { %p2597_p0 = pnand %p2596_p13, %p2592_p8 }
 0x39c   : > { %2148 = vmatmul.msk.bf16.gmra.mxu0 %vm676_vm0, %v1526_v54 }
 0x39d   : > { %v3115_v62 = vpop.f32.mrf.mxu1 }
 0x39e   : > { %v3184_v53 = vmul.f32 0.17677669, %v3115_v62 }
 0x3a5   : > { %v3117_v4 = vpop.f32.mrf.mxu1 }
 0x3a9   : > { %v3119_v7 = vpop.f32.mrf.mxu0 }
 0x3ad   : > { %v1293_v10 = vpop.f32.mrf.mxu1 }
 0x3ae   : > { %v3127_v3 = vmul.f32 0.17677669, %v1293_v10 }
 0x3b0   : > { %v1324_v17 = vsel %vm738_vm1, %v3127_v3, -inf }
 0x3b1   : > { %v3121_v2 = vpop.f32.mrf.mxu0 }
 0x3b2   : > { %v898_v11 = vpack.c.bf16 %v3121_v2, %v3119_v7 }
 0x3b5   : > { %v1296_v18 = vpop.f32.mrf.mxu1 }
 0x3b6   : > { %v3139_v21 = vmul.f32 0.17677669, %v1296_v18 }
 0x3b8   : > { %v1327_v29 = vsel %vm738_vm1, %v3139_v21, -inf }
 0x3b9   : > { %v3129_v9 = vpop.f32.mrf.mxu0 }
 0x3ba   : > { %1313 = vmax.xlane.f32.xlu2 %v1312_v5  ;;  %v1001_v5 = vsub.f32 %v3060_v50, %v979_v36 }
 0x3bc   : > { %1325 = vmax.xlane.f32.xlu1 %v1324_v17  ;;  %v1318_v17 = vsel %vm738_vm1, %v3184_v53, -inf }
 0x3bd   : > { %v1298_v32 = vpop.f32.mrf.mxu1 }
 0x3be   : > { %v3152_v35 = vmul.f32 0.17677669, %v1298_v32 }
 0x3bf   : > { %1310 = vmax.xlane.f32.xlu0 %v1309_v20  ;;  %v1009_v20 = vmul.f32 1.442695, %v1001_v5 }
 0x3c0   : > { %v1330_v48 = vsel %vm738_vm1, %v3152_v35, -inf }
 0x3c1   : > { %v3141_v23 = vpop.f32.mrf.mxu0 }
 0x3c2   : > { %v899_v58 = vpack.c.bf16 %v3141_v23, %v3129_v9 }
 0x3c4   : > { %1328 = vmax.xlane.f32.xlu1 %v1327_v29 }
 0x3c7   : > { %1316 = vmax.xlane.f32.xlu0 %v1315_v63 }
 0x3c9   : > { %v3173_v44 = vpop.f32.mrf.mxu0 }
 0x3cc   : > { %v985_v37 = vpop.xlane.xlu1 %984 }
 0x3cd   : > { %v1003_v38 = vsub.f32 %v3078_v0, %v985_v37 }
 0x3cf   : > { %v1013_v6 = vmul.f32 1.442695, %v1003_v38  ;;  %1331 = vmax.xlane.f32.xlu0 %v1330_v48 }
 0x3d1   : > { %2359 = vpow2.f32 %v1013_v6  ;;  %v3180_v28 = vpop.f32.mrf.mxu0 }
 0x3d2   : > { %1407 = vrot.lane.b32.xlu2 %v3000_v49, %s2673_s2 }
 0x3d4   : > { %v988_v26 = vpop.xlane.xlu2 %987 }
 0x3d5   : > { %v1004_v39 = vsub.f32 %v3083_v42, %v988_v26 }
 0x3d7   : > { %v3164_v31 = vpop.eup %2359  ;;  %v1015_v0 = vmul.f32 1.442695, %v1004_v39  ;;  %1029 = vadd.xlane.f32.xlu0 %v1028_v47 }
 0x3d8   : > { %v1031_v40 = vsel %vm738_vm1, %v3164_v31, 0.0 }
 0x3d9   : > { %2361 = vpow2.f32 %v1015_v0  ;;  %1032 = vadd.xlane.f32.xlu1 %v1031_v40  ;;  %v3198_v24 = vpop.f32.mrf.mxu0 }
 0x3dc   : > { %v991_v60 = vpop.xlane.xlu0 %990 }
 0x3dd   : > { %v1005_v30 = vsub.f32 %v3087_v43, %v991_v60 }
 0x3df   : > { %v3168_v27 = vpop.eup %2361 }
 0x3e0   : > { %v1034_v13 = vsel %vm738_vm1, %v3168_v27, 0.0 }
 0x3e1   : > { %1035 = vadd.xlane.f32.xlu0 %v1034_v13  ;;  %v3207_v36 = vpop.f32.mrf.mxu0 }
 0x3e4   : > { %v994_v16 = vpop.xlane.xlu1 %993 }
 0x3e5   : > { %v1006_v42 = vsub.f32 %v3092_v45, %v994_v16 }
 0x3e7   : > { %v1019_v52 = vmul.f32 1.442695, %v1006_v42 }
 0x3e9   : > { %2363 = vpow2.f32 %v1019_v52  ;;  %v1568_v6 = vpop.f32.mrf.mxu0 }
 0x3ea   : > { %v3215_v26 = vmul.f32 0.17677669, %v1568_v6 }
 0x3ec   : > { %v997_v34 = vpop.xlane.xlu2 %996  ;;  %v1596_v39 = vsel %vm738_vm1, %v3215_v26, -inf }
 0x3ed   : > { %v1007_v55 = vsub.f32 %v3096_v46, %v997_v34 }
 0x3ef   : > { %v3176_v56 = vpop.eup %2363  ;;  %v1021_v12 = vmul.f32 1.442695, %v1007_v55 }
 0x3f0   : > { %v1040_v59 = vsel %vm738_vm1, %v3176_v56, 0.0 }
 0x3f1   : > { %2365 = vpow2.f32 %v1021_v12  ;;  %1041 = vadd.xlane.f32.xlu1 %v1040_v59  ;;  %v1570_v47 = vpop.f32.mrf.mxu0 }
 0x3f4   : > { %v1000_v22 = vpop.xlane.xlu0 %999  ;;  %v1074_v29 = vpop.permute.xlu2 %1073 }
 0x3f5   : > { %v1008_v45 = vsub.f32 %v3101_v57, %v1000_v22  ;;  %v3194_v57 = vmul.f32 0.17677669, %v3117_v4  ;;  %v1017_v4 = vmul.f32 1.442695, %v1005_v30  ;;  %v3231_v22 = vmul.f32 0.17677669, %v1570_v47 }
 0x3f7   : > { %v3186_v54 = vpop.eup %2365  ;;  %v1023_v10 = vmul.f32 1.442695, %v1008_v45  ;;  %v1321_v63 = vsel %vm738_vm1, %v3194_v57, -inf  ;;  %v1599_v45 = vsel %vm738_vm1, %v3231_v22, -inf }
 0x3f8   : > { %v1043_v46 = vsel %vm738_vm1, %v3186_v54, 0.0 }
 0x3f9   : > { %2367 = vpow2.f32 %v1023_v10  ;;  %1044 = vadd.xlane.f32.xlu1 %v1043_v46  ;;  %v1573_v34 = vpop.f32.mrf.mxu0 }
 0x3fa   : > { %2369 = vpow2.f32 %v1009_v20 }
 0x3fb   : > { %1319 = vmax.xlane.f32.xlu2 %v1318_v17  ;;  %2371 = vpow2.f32 %v1017_v4 }
 0x3fc   : > { %v1076_v18 = vpop.permute.xlu1 %1075 }
 0x3fd   : > { %1097 = vmatpush.bf16.msrb.mxu2 %v1076_v18  ;;  %2216 = vmatpush.bf16.msrb.mxu3 %v1076_v18 }
 0x3ff   : > { %v3196_v62 = vpop.eup %2367 }
 0x400   : > { %v1046_v50 = vsel %vm738_vm1, %v3196_v62, 0.0  ;;  %v3205_v32 = vpop.eup %2369 }
 0x401   : > { %1098 = vmatpush.bf16.msrb.mxu2 %v1074_v29  ;;  %2217 = vmatpush.bf16.msrb.mxu3 %v1074_v29  ;;  %v1025_v37 = vsel %vm738_vm1, %v3205_v32, 0.0  ;;  %v3211_v38 = vpop.eup %2371 }
 0x402   : > { %1047 = vadd.xlane.f32.xlu0 %v1046_v50  ;;  %v1037_v48 = vsel %vm738_vm1, %v3211_v38, 0.0 }
 0x403   : > { %1322 = vmax.xlane.f32.xlu2 %v1321_v63 }
 0x404   : > { %v1070_v43 = vpop.permute.xlu1 %1069 }
 0x407   : > { %v1072_v33 = vpop.permute.xlu0 %1071 }
 0x408   : > { %1099 = vmatpush.bf16.msrb.mxu2 %v1072_v33  ;;  %2218 = vmatpush.bf16.msrb.mxu3 %v1072_v33 }
 0x40b   : > { %1026 = vadd.xlane.f32.xlu2 %v1025_v37 }
 0x40c   : > { %1100 = vmatpush.bf16.msrb.mxu2 %v1070_v43  ;;  %2219 = vmatpush.bf16.msrb.mxu3 %v1070_v43 }
 0x413   : > { %1038 = vadd.xlane.f32.xlu2 %v1037_v48 }
 0x41b   : > { %1597 = vmax.xlane.f32.xlu2 %v1596_v39 }
 0x42d   : > { %v1314_v0 = vpop.xlane.xlu2 %1313 }
 0x42e   : > { %v1334_v40 = vsub.f32 %v3125_v1, %v1314_v0 }
 0x42f   : > { %v3235_v46 = vpop.xlane.xlu1 %1325 }
 0x430   : > { %v1343_v13 = vmul.f32 1.442695, %v1334_v40 }
 0x432   : > { %2373 = vpow2.f32 %v1343_v13  ;;  %v1311_v16 = vpop.xlane.xlu0 %1310 }
 0x433   : > { %v1333_v42 = vsub.f32 %v3133_v15, %v1311_v16  ;;  %1403 = vrot.lane.b32.xlu2 %v3005_v51, %s2673_s2  ;;  %v1575_v15 = vpop.f32.mrf.mxu0 }
 0x435   : > { %v1341_v52 = vmul.f32 1.442695, %v1333_v42  ;;  %v1408_v60 = vpop.permute.xlu2 %1407 }
 0x436   : > { %1429 = vmatpush.bf16.msra.mxu2 %v1408_v60  ;;  %v3263_v60 = vmul.f32 0.17677669, %v1575_v15 }
 0x437   : > { %2375 = vpow2.f32 %v1341_v52  ;;  %v3244_v50 = vpop.xlane.xlu1 %1328 }
 0x438   : > { %v3223_v55 = vpop.eup %2373 }
 0x439   : > { %v1360_v12 = vsel %vm738_vm1, %v3223_v55, 0.0 }
 0x43a   : > { %1361 = vadd.xlane.f32.xlu0 %v1360_v12  ;;  %v1317_v5 = vpop.xlane.xlu0 %1316 }
 0x43b   : > { %v1578_v10 = vpop.f32.mrf.mxu0  ;;  %v1335_v17 = vsub.f32 %v3143_v25, %v1317_v5 }
 0x43c   : > { %v3274_v15 = vmul.f32 0.17677669, %v1578_v10 }
 0x43d   : > { %v3227_v1 = vpop.eup %2375  ;;  %v1345_v20 = vmul.f32 1.442695, %v1335_v17 }
 0x43e   : > { %v1357_v59 = vsel %vm738_vm1, %v3227_v1, 0.0 }
 0x43f   : > { %1358 = vadd.xlane.f32.xlu1 %v1357_v59  ;;  %2377 = vpow2.f32 %v1345_v20  ;;  %v3265_v59 = vmul.f32 0.17677669, %v1573_v34  ;;  %v1608_v20 = vsel %vm738_vm1, %v3274_v15, -inf }
 0x442   : > { %v3246_v30 = vpop.xlane.xlu0 %1331 }
 0x443   : > { %v1580_v18 = vpop.f32.mrf.mxu0 }
 0x444   : > { %v3242_v29 = vmul.f32 0.17677669, %v1580_v18  ;;  %v1602_v18 = vsel %vm738_vm1, %v3265_v59, -inf }
 0x445   : > { %v3252_v25 = vpop.eup %2377 }
 0x446   : > { %v1611_v63 = vsel %vm738_vm1, %v3242_v29, -inf  ;;  %v1363_v4 = vsel %vm738_vm1, %v3252_v25, 0.0 }
 0x447   : > { %1600 = vmax.xlane.f32.xlu1 %v1599_v45 }
 0x44a   : > { %v1030_v33 = vpop.xlane.xlu0 %1029 }
 0x44b   : > { %v1583_v34 = vpop.f32.mrf.mxu0 }
 0x44e   : > { %1694 = vrot.lane.b32.xlu0 %v3000_v49, %s2674_s3  ;;  %v1033_v49 = vpop.xlane.xlu1 %1032 }
 0x454   : > { %v1036_v43 = vpop.xlane.xlu0 %1035 }
 0x456   : > { %1401 = vrot.lane.b32.xlu0 %v3009_v14, %s2673_s2 }
 0x45c   : > { %1612 = vmax.xlane.f32.xlu2 %v1611_v63 }
 0x45e   : > { %1692 = vrot.lane.b32.xlu0 %v3002_v8, %s2674_s3 }
 0x460   : > { %1405 = vrot.lane.b32.xlu1 %v3002_v8, %s2673_s2 }
 0x464   : > { %1364 = vadd.xlane.f32.xlu2 %v1363_v4  ;;  %v1042_v37 = vpop.xlane.xlu1 %1041 }
 0x46c   : > { %v1045_v6 = vpop.xlane.xlu1 %1044 }
 0x46d   : > { %2379 = vrcp.f32 %v1045_v6 }
 0x46e   : > { %v3258_v48 = vpop.xlane.xlu2 %1319 }
 0x473   : > { %v2380_v0 = vpop.eup %2379 }
 0x474   : > { %v1063_v13 = vmul.f32 %v2380_v0, %v3186_v54  ;;  %v1605_v54 = vsel %vm738_vm1, %v3263_v60, -inf  ;;  %v1585_v0 = vpop.f32.mrf.mxu0 }
 0x475   : > { %v1048_v39 = vpop.xlane.xlu0 %1047 }
 0x476   : > { %2381 = vrcp.f32 %v1048_v39  ;;  %v1323_v47 = vpop.xlane.xlu2 %1322  ;;  %v3280_v39 = vmul.f32 0.17677669, %v1583_v34 }
 0x477   : > { %2383 = vrcp.f32 %v1030_v33  ;;  %v1337_v4 = vsub.f32 %v3194_v57, %v1323_v47  ;;  %v3291_v47 = vmul.f32 0.17677669, %v1585_v0 }
 0x47c   : > { %v2382_v40 = vpop.eup %2381 }
 0x47d   : > { %v1064_v8 = vmul.f32 %v2382_v40, %v3196_v62  ;;  %v2384_v52 = vpop.eup %2383 }
 0x47e   : > { %v1027_v16 = vpop.xlane.xlu2 %1026  ;;  %v1058_v45 = vmul.f32 %v2384_v52, %v3159_v61 }
 0x47f   : > { %2385 = vrcp.f32 %v1027_v16  ;;  %v1068_v42 = vpack.c.bf16 %v1064_v8, %v1063_v13 }
 0x480   : > { %2387 = vrcp.f32 %v1036_v43  ;;  %v1349_v43 = vmul.f32 1.442695, %v1337_v4 }
 0x481   : > { %2100 = vmatmul.msk.bf16.vlgmr.msrb.gmra.mxu3 %vm738_vm1, %v1068_v42  ;;  %2389 = vrcp.f32 %v1033_v49 }
 0x485   : > { %v2386_v12 = vpop.eup %2385 }
 0x486   : > { %v1057_v5 = vmul.f32 %v2386_v12, %v3205_v32  ;;  %v1039_v17 = vpop.xlane.xlu2 %1038  ;;  %v2388_v63 = vpop.eup %2387 }
 0x487   : > { %v2390_v6 = vpop.eup %2389  ;;  %v1060_v10 = vmul.f32 %v2388_v63, %v3168_v27  ;;  %v1617_v27 = vsel %vm738_vm1, %v3291_v47, -inf }
 0x488   : > { %1606 = vmax.xlane.f32.xlu0 %v1605_v54  ;;  %v1065_v62 = vpack.c.bf16 %v1058_v45, %v1057_v5  ;;  %v1059_v49 = vmul.f32 %v2390_v6, %v3164_v31 }
 0x48a   : > { %1603 = vmax.xlane.f32.xlu1 %v1602_v18  ;;  %2097 = vmatmul.msk.bf16.vlgmr.msrb.gmra.mxu2 %vm738_vm1, %v1065_v62  ;;  %v1066_v40 = vpack.c.bf16 %v1060_v10, %v1059_v49 }
 0x48e   : > { %v1598_v61 = vpop.xlane.xlu2 %1597 }
 0x48f   : > { %v1620_v32 = vsub.f32 %v3215_v26, %v1598_v61  ;;  %v1614_v26 = vsel %vm738_vm1, %v3280_v39, -inf  ;;  %v1336_v61 = vsub.f32 %v3184_v53, %v3258_v48 }
 0x490   : > { %1609 = vmax.xlane.f32.xlu0 %v1608_v20  ;;  %v1339_v20 = vsub.f32 %v3139_v21, %v3244_v50  ;;  %v2202_v50 = vld [vmem:[#allocation8 + $0x18] sm:$0xff] }
 0x491   : > { %v1628_v33 = vmul.f32 1.442695, %v1620_v32  ;;  %1156 = vmatpush.bf16.msra.mxu3 %v2202_v50 }
 0x492   : > { %v1353_v6 = vmul.f32 1.442695, %v1339_v20 }
 0x493   : > { %2391 = vpow2.f32 %v1628_v33 }
 0x494   : > { %2393 = vpow2.f32 %v1349_v43 }
 0x495   : > { %2395 = vrcp.f32 %v1039_v17 }
 0x496   : > { %2397 = vrcp.f32 %v1042_v37  ;;  %v1404_v4 = vpop.permute.xlu2 %1403 }
 0x498   : > { %1615 = vmax.xlane.f32.xlu0 %v1614_v26 }
 0x499   : > { %v3286_v13 = vpop.eup %2391 }
 0x49a   : > { %2098 = vmatmul.msk.bf16.gmra.mxu2 %vm738_vm1, %v1066_v40  ;;  %v1644_v57 = vsel %vm738_vm1, %v3286_v13, 0.0  ;;  %v3293_v31 = vpop.eup %2393 }
 0x49b   : > { %1645 = vadd.xlane.f32.xlu2 %v1644_v57  ;;  %v2396_v8 = vpop.eup %2395  ;;  %v1369_v16 = vsel %vm738_vm1, %v3293_v31, 0.0 }
 0x49c   : > { %v2398_v42 = vpop.eup %2397  ;;  %v1061_v52 = vmul.f32 %v2396_v8, %v3211_v38 }
 0x49d   : > { %v1062_v12 = vmul.f32 %v2398_v42, %v3176_v56 }
 0x49f   : > { %v1067_v45 = vpack.c.bf16 %v1062_v12, %v1061_v52  ;;  %v1338_v52 = vsub.f32 %v3127_v3, %v3235_v46 }
 0x4a0   : > { %1618 = vmax.xlane.f32.xlu0 %v1617_v27 }
 0x4a3   : > { %1370 = vadd.xlane.f32.xlu2 %v1369_v16 }
 0x4aa   : > { %2099 = vmatmul.msk.bf16.gmra.mxu2 %vm738_vm1, %v1067_v45 }
 0x4ad   : > { %v1362_v5 = vpop.xlane.xlu0 %1361 }
 0x4b2   : > { %v1359_v37 = vpop.xlane.xlu1 %1358 }
 0x4b4   : > { %1690 = vrot.lane.b32.xlu0 %v3005_v51, %s2674_s3  ;;  %v1347_v51 = vmul.f32 1.442695, %v1336_v61 }
 0x4ba   : > { %v1601_v17 = vpop.xlane.xlu1 %1600 }
 0x4bb   : > { %v1621_v54 = vsub.f32 %v3231_v22, %v1601_v17 }
 0x4bd   : > { %v1630_v62 = vmul.f32 1.442695, %v1621_v54 }
 0x4bf   : > { %2399 = vpow2.f32 %v1630_v62 }
 0x4c0   : > { %v1695_v18 = vpop.permute.xlu0 %1694  ;;  %2401 = vrcp.f32 %v1359_v37 }
 0x4c1   : > { %1716 = vmatpush.bf16.msrb.mxu1 %v1695_v18  ;;  %2403 = vrcp.f32 %v1362_v5 }
 0x4c2   : > { %2405 = vpow2.f32 %v1347_v51  ;;  %v1340_v51 = vsub.f32 %v3152_v35, %v3246_v30 }
 0x4c3   : > { %2407 = vpow2.f32 %v1353_v6 }
 0x4c5   : > { %v3305_v34 = vpop.eup %2399 }
 0x4c6   : > { %v1647_v56 = vsel %vm738_vm1, %v3305_v34, 0.0  ;;  %v2402_v63 = vpop.eup %2401 }
 0x4c7   : > { %1648 = vadd.xlane.f32.xlu1 %v1647_v56  ;;  %v2404_v33 = vpop.eup %2403  ;;  %v1389_v10 = vmul.f32 %v2402_v63, %v3227_v1 }
 0x4c8   : > { %v1402_v38 = vpop.permute.xlu0 %1401  ;;  %v3314_v43 = vpop.eup %2405  ;;  %v1390_v53 = vmul.f32 %v2404_v33, %v3223_v55  ;;  %v2201_v55 = vld [vmem:[#allocation8 + $0x10] sm:$0xff] }
 0x4c9   : > { %v1366_v49 = vsel %vm738_vm1, %v3314_v43, 0.0  ;;  %v3322_v21 = vpop.eup %2407  ;;  %1157 = vmatpush.bf16.msra.mxu3 %v2201_v55 }
 0x4ca   : > { %v1397_v48 = vpack.c.bf16 %v1390_v53, %v1389_v10  ;;  %v1375_v1 = vsel %vm738_vm1, %v3322_v21, 0.0 }
 0x4cd   : > { %2220 = vmatpush.bf16.msrb.mxu3 %v3035_v19 }
 0x4cf   : > { %v1613_v37 = vpop.xlane.xlu2 %1612 }
 0x4d0   : > { %v1693_v32 = vpop.permute.xlu0 %1692  ;;  %v1625_v46 = vsub.f32 %v3242_v29, %v1613_v37 }
 0x4d1   : > { %1717 = vmatpush.bf16.msrb.mxu1 %v1693_v32  ;;  %2221 = vmatpush.bf16.msrb.mxu3 %v3038_v41  ;;  %v1355_v32 = vmul.f32 1.442695, %v1340_v51 }
 0x4d2   : > { %v1406_v22 = vpop.permute.xlu1 %1405 }
 0x4d3   : > { %1430 = vmatpush.bf16.msra.mxu2 %v1406_v22 }
 0x4d7   : > { %1431 = vmatpush.bf16.msra.mxu2 %v1404_v4 }
 0x4db   : > { %1432 = vmatpush.bf16.msra.mxu2 %v1402_v38 }
 0x4de   : > { %1367 = vadd.xlane.f32.xlu0 %v1366_v49  ;;  %2129 = vmatmul.msk.bf16.vlgmr.msra.gmra.mxu2 %vm738_vm1, %v1397_v48 }
 0x4e0   : > { %1688 = vrot.lane.b32.xlu1 %v3009_v14, %s2674_s3 }
 0x4e6   : > { %1376 = vadd.xlane.f32.xlu0 %v1375_v1 }
 0x4fb   : > { %v1607_v26 = vpop.xlane.xlu0 %1606 }
 0x4fc   : > { %v1623_v14 = vsub.f32 %v3263_v60, %v1607_v26 }
 0x4fd   : > { %v1604_v0 = vpop.xlane.xlu1 %1603 }
 0x4fe   : > { %v1622_v40 = vsub.f32 %v3265_v59, %v1604_v0  ;;  %v1634_v27 = vmul.f32 1.442695, %v1623_v14  ;;  %v1351_v59 = vmul.f32 1.442695, %v1338_v52  ;;  %v1365_v0 = vpop.xlane.xlu2 %1364 }
 0x500   : > { %v1632_v57 = vmul.f32 1.442695, %v1622_v40 }
 0x502   : > { %2409 = vpow2.f32 %v1632_v57 }
 0x503   : > { %v1610_v8 = vpop.xlane.xlu0 %1609  ;;  %2411 = vpow2.f32 %v1634_v27 }
 0x504   : > { %v1624_v16 = vsub.f32 %v3274_v15, %v1610_v8  ;;  %v1117_v26 = vpop.f32.mrf.mxu3  ;;  %v2204_v8 = vld [vmem:[#allocation8 + $0x28] sm:$0xff] }
 0x506   : > { %v1636_v42 = vmul.f32 1.442695, %v1624_v16  ;;  %v2203_v16 = vld [vmem:[#allocation8 + $0x20] sm:$0xff] }
 0x508   : > { %v3333_v19 = vpop.eup %2409  ;;  %2413 = vpow2.f32 %v1636_v42 }
 0x509   : > { %v1650_v41 = vsel %vm738_vm1, %v3333_v19, 0.0  ;;  %v3338_v45 = vpop.eup %2411  ;;  %2415 = vpow2.f32 %v1351_v59 }
 0x50a   : > { %1651 = vadd.xlane.f32.xlu2 %v1650_v41  ;;  %v1653_v54 = vsel %vm738_vm1, %v3338_v45, 0.0 }
 0x50b   : > { %v1616_v60 = vpop.xlane.xlu0 %1615 }
 0x50c   : > { %v1626_v12 = vsub.f32 %v3280_v39, %v1616_v60  ;;  %v1638_v39 = vmul.f32 1.442695, %v1625_v46  ;;  %v1119_v40 = vpop.f32.mrf.mxu3 }
 0x50d   : > { %v1102_v15 = vpop.f32.mrf.mxu2  ;;  %v1125_v57 = vpack.c.bf16 %v1119_v40, %v1117_v26 }
 0x50e   : > { %v3340_v5 = vpop.eup %2413  ;;  %v1640_v17 = vmul.f32 1.442695, %v1626_v12  ;;  %v1646_v27 = vpop.xlane.xlu2 %1645 }
 0x50f   : > { %v1656_v3 = vsel %vm738_vm1, %v3340_v5, 0.0  ;;  %v3347_v62 = vpop.eup %2415 }
 0x510   : > { %2417 = vpow2.f32 %v1640_v17  ;;  %1657 = vadd.xlane.f32.xlu1 %v1656_v3  ;;  %v1372_v29 = vsel %vm738_vm1, %v3347_v62, 0.0 }
 0x511   : > { %2419 = vpow2.f32 %v1638_v39 }
 0x512   : > { %1654 = vadd.xlane.f32.xlu2 %v1653_v54  ;;  %2421 = vpow2.f32 %v1355_v32 }
 0x513   : > { %v1619_v22 = vpop.xlane.xlu0 %1618 }
 0x514   : > { %v1627_v4 = vsub.f32 %v3291_v47, %v1619_v22 }
 0x515   : > { %v1104_v18 = vpop.f32.mrf.mxu2 }
 0x516   : > { %v3349_v56 = vpop.eup %2417  ;;  %v1122_v38 = vpack.c.bf16 %v1104_v18, %v1102_v15  ;;  %v1642_v35 = vmul.f32 1.442695, %v1627_v4  ;;  %v1371_v39 = vpop.xlane.xlu2 %1370 }
 0x517   : > { %v1662_v61 = vsel %vm738_vm1, %v3349_v56, 0.0  ;;  %v3358_v63 = vpop.eup %2419 }
 0x518   : > { %2109 = vmatmul.msk.bf16.vlgmr.msra.gmra.mxu3 %vm676_vm0, %v1122_v38  ;;  %1663 = vadd.xlane.f32.xlu0 %v1662_v61  ;;  %v1659_v33 = vsel %vm738_vm1, %v3358_v63, 0.0  ;;  %v3363_v6 = vpop.eup %2421  ;;  %2423 = vpow2.f32 %v1642_v35 }
 0x519   : > { %v1378_v48 = vsel %vm738_vm1, %v3363_v6, 0.0  ;;  %1488 = vmatpush.bf16.msra.mxu3 %v2204_v8 }
 0x51a   : > { %1373 = vadd.xlane.f32.xlu2 %v1372_v29 }
 0x51d   : > { %v1107_v20 = vpop.f32.mrf.mxu2  ;;  %1489 = vmatpush.bf16.msra.mxu3 %v2203_v16 }
 0x51e   : > { %v3368_v47 = vpop.eup %2423 }
 0x51f   : > { %v1665_v1 = vsel %vm738_vm1, %v3368_v47, 0.0 }
 0x522   : > { %1660 = vadd.xlane.f32.xlu2 %v1659_v33 }
 0x525   : > { %v1109_v30 = vpop.f32.mrf.mxu2 }
 0x526   : > { %v1123_v10 = vpack.c.bf16 %v1109_v30, %v1107_v20  ;;  %v1691_v53 = vpop.permute.xlu0 %1690 }
 0x527   : > { %1718 = vmatpush.bf16.msrb.mxu1 %v1691_v53 }
 0x528   : > { %2110 = vmatmul.msk.bf16.gmra.mxu3 %vm676_vm0, %v1123_v10 }
 0x52a   : > { %1379 = vadd.xlane.f32.xlu2 %v1378_v48 }
 0x52d   : > { %v1112_v49 = vpop.f32.mrf.mxu2 }
 0x532   : > { %1666 = vadd.xlane.f32.xlu2 %v1665_v1 }
 0x535   : > { %v1114_v50 = vpop.f32.mrf.mxu2 }
 0x536   : > { %v1124_v55 = vpack.c.bf16 %v1114_v50, %v1112_v49  ;;  %v2206_v49 = vld [vmem:[#allocation8 + $0x38] sm:$0xff] }
 0x537   : > { %1775 = vmatpush.bf16.msrb.mxu2 %v2206_v49 }
 0x538   : > { %2111 = vmatmul.msk.bf16.gmra.mxu3 %vm676_vm0, %v1124_v55 }
 0x53a   : > { %v1649_v14 = vpop.xlane.xlu1 %1648 }
 0x53b   : > { %2425 = vrcp.f32 %v1649_v14 }
 0x53c   : > { %2427 = vrcp.f32 %v1646_v27 }
 0x53d   : > { %2429 = vrcp.f32 %v1365_v0 }
 0x541   : > { %v2426_v42 = vpop.eup %2425 }
 0x542   : > { %v2428_v52 = vpop.eup %2427  ;;  %v1677_v41 = vmul.f32 %v2426_v42, %v3305_v34 }
 0x543   : > { %v1676_v60 = vmul.f32 %v2428_v52, %v3286_v13  ;;  %v2430_v15 = vpop.eup %2429 }
 0x544   : > { %v1391_v3 = vmul.f32 %v2430_v15, %v3252_v25 }
 0x545   : > { %v1684_v37 = vpack.c.bf16 %v1677_v41, %v1676_v60 }
 0x548   : > { %2112 = vmatmul.msk.bf16.gmra.mxu3 %vm676_vm0, %v1125_v57 }
 0x551   : > { %v1368_v59 = vpop.xlane.xlu0 %1367 }
 0x552   : > { %2431 = vrcp.f32 %v1368_v59  ;;  %v1689_v12 = vpop.permute.xlu1 %1688 }
 0x553   : > { %1719 = vmatpush.bf16.msrb.mxu1 %v1689_v12 }
 0x556   : > { %2149 = vmatmul.msk.bf16.vlgmr.msrb.gmra.mxu1 %vm738_vm1, %v1684_v37 }
 0x558   : > { %v2432_v17 = vpop.eup %2431  ;;  %2123 = vmatmul.msk.bf16.vlgmr.msrb.gmra.mxu3 %vm676_vm0, %v898_v11 }
 0x559   : > { %v1392_v34 = vmul.f32 %v2432_v17, %v3314_v43  ;;  %v1377_v4 = vpop.xlane.xlu0 %1376 }
 0x55b   : > { %v1398_v46 = vpack.c.bf16 %v1392_v34, %v1391_v3 }
 0x55d   : > { %2130 = vmatmul.msk.bf16.gmra.mxu2 %vm738_vm1, %v1398_v46 }
 0x561   : > { %v1434_v13 = vpop.f32.mrf.mxu2 }
 0x568   : > { %2124 = vmatmul.msk.bf16.gmra.mxu3 %vm676_vm0, %v899_v58 }
 0x569   : > { %v1436_v54 = vpop.f32.mrf.mxu2 }
 0x56a   : > { %v1454_v18 = vpack.c.bf16 %v1436_v54, %v1434_v13 }
 0x578   : > { %2141 = vmatmul.msk.bf16.vlgmr.msra.gmra.mxu3 %vm676_vm0, %v1454_v18 }
 0x57d   : > { %v1652_v7 = vpop.xlane.xlu2 %1651 }
 0x57e   : > { %2433 = vrcp.f32 %v1652_v7 }
 0x583   : > { %v1658_v58 = vpop.xlane.xlu1 %1657 }
 0x584   : > { %v2434_v11 = vpop.eup %2433 }
 0x585   : > { %v1655_v2 = vpop.xlane.xlu2 %1654  ;;  %v1678_v43 = vmul.f32 %v2434_v11, %v3333_v19 }
 0x586   : > { %2435 = vrcp.f32 %v1655_v2 }
 0x587   : > { %2437 = vrcp.f32 %v1371_v39 }
 0x58c   : > { %v2436_v25 = vpop.eup %2435 }
 0x58d   : > { %v1679_v38 = vmul.f32 %v2436_v25, %v3338_v45  ;;  %v1374_v9 = vpop.xlane.xlu2 %1373  ;;  %v2438_v61 = vpop.eup %2437 }
 0x58e   : > { %2439 = vrcp.f32 %v1374_v9  ;;  %v1393_v32 = vmul.f32 %v2438_v61, %v3293_v31  ;;  %v1664_v31 = vpop.xlane.xlu0 %1663 }
 0x58f   : > { %v1685_v23 = vpack.c.bf16 %v1679_v38, %v1678_v43  ;;  %2441 = vrcp.f32 %v1658_v58 }
 0x591   : > { %2150 = vmatmul.msk.bf16.gmra.mxu1 %vm738_vm1, %v1685_v23 }
 0x594   : > { %v2440_v51 = vpop.eup %2439 }
 0x595   : > { %v1661_v29 = vpop.xlane.xlu2 %1660  ;;  %v1394_v22 = vmul.f32 %v2440_v51, %v3347_v62  ;;  %v2442_v19 = vpop.eup %2441 }
 0x596   : > { %2443 = vrcp.f32 %v1661_v29  ;;  %v1680_v35 = vmul.f32 %v2442_v19, %v3340_v5  ;;  %v2324_v19 = vld [vmem:[%s3496_s4] ss:$0 sm:$0xff] }
 0x597   : > { %v1399_v20 = vpack.c.bf16 %v1394_v22, %v1393_v32  ;;  %2445 = vrcp.f32 %v1377_v4 }
 0x599   : > { %2131 = vmatmul.msk.bf16.gmra.mxu2 %vm738_vm1, %v1399_v20 }
 0x59b   : > { %v3395_v45 = vpop.f32.mrf.mxu3 }
 0x59c   : > { %v2444_v33 = vpop.eup %2443  ;;  %v1213_v20 = vadd.f32 %v3173_v44, %v3395_v45 }
 0x59d   : > { %v1681_v30 = vmul.f32 %v2444_v33, %v3358_v63  ;;  %v1380_v10 = vpop.xlane.xlu2 %1379  ;;  %v2446_v62 = vpop.eup %2445 }
 0x59e   : > { %2447 = vrcp.f32 %v1380_v10  ;;  %v1395_v55 = vmul.f32 %v2446_v62, %v3322_v21  ;;  %v2205_v21 = vld [vmem:[#allocation8 + $0x30] sm:$0xff] }
 0x59f   : > { %v1686_v53 = vpack.c.bf16 %v1681_v30, %v1680_v35  ;;  %2449 = vrcp.f32 %v1664_v31  ;;  %1776 = vmatpush.bf16.msrb.mxu2 %v2205_v21 }
 0x5a1   : > { %2151 = vmatmul.msk.bf16.gmra.mxu1 %vm738_vm1, %v1686_v53 }
 0x5a3   : > { %v3400_v48 = vpop.f32.mrf.mxu3 }
 0x5a4   : > { %v2448_v1 = vpop.eup %2447  ;;  %v1215_v53 = vadd.f32 %v3180_v28, %v3400_v48 }
 0x5a5   : > { %v1667_v50 = vpop.xlane.xlu2 %1666  ;;  %v1396_v26 = vmul.f32 %v2448_v1, %v3363_v6  ;;  %v2450_v63 = vpop.eup %2449 }
 0x5a6   : > { %2451 = vrcp.f32 %v1667_v50  ;;  %v1682_v14 = vmul.f32 %v2450_v63, %v3349_v56 }
 0x5a7   : > { %v1400_v5 = vpack.c.bf16 %v1396_v26, %v1395_v55 }
 0x5a9   : > { %2132 = vmatmul.msk.bf16.gmra.mxu2 %vm738_vm1, %v1400_v5 }
 0x5ab   : > { %v3405_v0 = vpop.f32.mrf.mxu3 }
 0x5ac   : > { %v2452_v40 = vpop.eup %2451  ;;  %v1218_v1 = vadd.f32 %v3198_v24, %v3405_v0 }
 0x5ad   : > { %v1683_v57 = vmul.f32 %v2452_v40, %v3368_v47 }
 0x5af   : > { %v1687_v27 = vpack.c.bf16 %v1683_v57, %v1682_v14 }
 0x5b1   : > { %2152 = vmatmul.msk.bf16.gmra.mxu1 %vm738_vm1, %v1687_v27 }
 0x5b3   : > { %v3410_v8 = vpop.f32.mrf.mxu3 }
 0x5b4   : > { %v1220_v5 = vadd.f32 %v3207_v36, %v3410_v8 }
 0x5bb   : > { %v1169_v6 = vpop.f32.mrf.mxu3 }
 0x5c3   : > { %v1171_v16 = vpop.f32.mrf.mxu3 }
 0x5cb   : > { %v1174_v42 = vpop.f32.mrf.mxu3 }
 0x5d3   : > { %v1176_v52 = vpop.f32.mrf.mxu3  ;;  %v1721_v41 = vpop.f32.mrf.mxu1 }
 0x5db   : > { %v1222_v59 = vpop.f32.mrf.mxu3  ;;  %v1723_v60 = vpop.f32.mrf.mxu1 }
 0x5dc   : > { %v3412_v12 = vadd.f32 %v1222_v59, %v1169_v6  ;;  %v1741_v37 = vpack.c.bf16 %v1723_v60, %v1721_v41 }
 0x5de   : > { %2161 = vmatmul.msk.bf16.vlgmr.msrb.gmra.mxu2 %vm676_vm0, %v1741_v37 }
 0x5e0   : > { %v1439_v56 = vpop.f32.mrf.mxu2 }
 0x5e3   : > { %v1224_v47 = vpop.f32.mrf.mxu3 }
 0x5e4   : > { %v3415_v15 = vadd.f32 %v1224_v47, %v1171_v16 }
 0x5e8   : > { %v1441_v17 = vpop.f32.mrf.mxu2 }
 0x5e9   : > { %v1455_v3 = vpack.c.bf16 %v1441_v17, %v1439_v56 }
 0x5eb   : > { %v1227_v34 = vpop.f32.mrf.mxu3  ;;  %2142 = vmatmul.msk.bf16.gmra.mxu3 %vm676_vm0, %v1455_v3 }
 0x5ec   : > { %v3418_v46 = vadd.f32 %v1227_v34, %v1174_v42 }
 0x5f3   : > { %v1229_v13 = vpop.f32.mrf.mxu3 }
 0x5f4   : > { %v3420_v54 = vadd.f32 %v1229_v13, %v1176_v52 }
 0x5fb   : > { %v1491_v22 = vpop.f32.mrf.mxu3 }
 0x5fc   : > { %v1511_v4 = vadd.f32 %v1491_v22, %v1213_v20 }
 0x603   : > { %v1493_v10 = vpop.f32.mrf.mxu3 }
 0x604   : > { %v1512_v44 = vadd.f32 %v1493_v10, %v1215_v53 }
 0x60e   : > { %v1726_v39 = vpop.f32.mrf.mxu1 }
 0x616   : > { %v1728_v18 = vpop.f32.mrf.mxu1 }
 0x617   : > { %v1742_v7 = vpack.c.bf16 %v1728_v18, %v1726_v39 }
 0x619   : > { %2162 = vmatmul.msk.bf16.gmra.mxu2 %vm676_vm0, %v1742_v7 }
 0x61c   : > { %v1444_v2 = vpop.f32.mrf.mxu2 }
 0x61e   : > { %v1731_v11 = vpop.f32.mrf.mxu1 }
 0x624   : > { %v1446_v25 = vpop.f32.mrf.mxu2 }
 0x625   : > { %v1456_v43 = vpack.c.bf16 %v1446_v25, %v1444_v2 }
 0x626   : > { %v1733_v38 = vpop.f32.mrf.mxu1 }
 0x627   : > { %v1743_v9 = vpack.c.bf16 %v1733_v38, %v1731_v11  ;;  %2143 = vmatmul.msk.bf16.gmra.mxu3 %vm676_vm0, %v1456_v43 }
 0x629   : > { %2163 = vmatmul.msk.bf16.gmra.mxu2 %vm676_vm0, %v1743_v9 }
 0x62c   : > { %v1449_v23 = vpop.f32.mrf.mxu2 }
 0x62e   : > { %v1736_v58 = vpop.f32.mrf.mxu1 }
 0x634   : > { %v1451_v61 = vpop.f32.mrf.mxu2 }
 0x635   : > { %v1457_v51 = vpack.c.bf16 %v1451_v61, %v1449_v23 }
 0x636   : > { %v1738_v29 = vpop.f32.mrf.mxu1 }
 0x637   : > { %v1744_v32 = vpack.c.bf16 %v1738_v29, %v1736_v58  ;;  %2144 = vmatmul.msk.bf16.gmra.mxu3 %vm676_vm0, %v1457_v51 }
 0x639   : > { %2164 = vmatmul.msk.bf16.gmra.mxu2 %vm676_vm0, %v1744_v32 }
 0x661   : > { %v1778_v33 = vpop.f32.mrf.mxu2 }
 0x662   : > { %v1798_v35 = vadd.f32 %v1778_v33, %v1511_v4 }
 0x664   : > { %v1810_v30 = vadd.f32 %v2324_v19, %v1798_v35 }
 0x666   : > { %1818 = vst [vmem:[%s3435_s13] sm:$0xff] %v1810_v30 }
 0x669   : > { %v1780_v45 = vpop.f32.mrf.mxu2 }
 0x66a   : > { %v1799_v31 = vadd.f32 %v1780_v45, %v1512_v44 }
 0x66c   : > { %v1811_v62 = vadd.f32 %v2324_v19, %v1799_v31 }
 0x66e   : > { %1819 = vst [vmem:[%s3435_s13 + $0x8] sm:$0xff] %v1811_v62  ;;  %v1496_v49 = vpop.f32.mrf.mxu3 }
 0x66f   : > { %v1513_v50 = vadd.f32 %v1496_v49, %v1218_v1 }
 0x676   : > { %v1498_v26 = vpop.f32.mrf.mxu3 }
 0x677   : > { %v1514_v63 = vadd.f32 %v1498_v26, %v1220_v5 }
 0x69c   : > { %v1783_v55 = vpop.f32.mrf.mxu2 }
 0x69d   : > { %v1800_v28 = vadd.f32 %v1783_v55, %v1513_v50 }
 0x69f   : > { %v1812_v48 = vadd.f32 %v2324_v19, %v1800_v28 }
 0x6a1   : > { %1820 = vst [vmem:[%s3435_s13 + $0x10] sm:$0xff] %v1812_v48 }
 0x6a4   : > { %v1785_v40 = vpop.f32.mrf.mxu2 }
 0x6a5   : > { %v1801_v14 = vadd.f32 %v1785_v40, %v1514_v63 }
 0x6a7   : > { %v1813_v57 = vadd.f32 %v2324_v19, %v1801_v14 }
 0x6a9   : > { %1821 = vst [vmem:[%s3435_s13 + $0x18] sm:$0xff] %v1813_v57 }
 0x6aa   : > { %v1501_v27 = vpop.f32.mrf.mxu3 }
 0x6ab   : > { %v1515_v24 = vadd.f32 %v1501_v27, %v3412_v12 }
 0x6ac   : > { %v1788_v0 = vpop.f32.mrf.mxu2 }
 0x6ad   : > { %v1802_v21 = vadd.f32 %v1788_v0, %v1515_v24 }
 0x6af   : > { %v1814_v6 = vadd.f32 %v2324_v19, %v1802_v21 }
 0x6b1   : > { %1822 = vst [vmem:[%s3435_s13 + $0x20] sm:$0xff] %v1814_v6 }
 0x6b2   : > { %v1503_v16 = vpop.f32.mrf.mxu3 }
 0x6b3   : > { %v1516_v36 = vadd.f32 %v1503_v16, %v3415_v15 }
 0x6b4   : > { %v1790_v8 = vpop.f32.mrf.mxu2 }
 0x6b5   : > { %v1803_v42 = vadd.f32 %v1790_v8, %v1516_v36 }
 0x6b7   : > { %v1815_v52 = vadd.f32 %v2324_v19, %v1803_v42 }
 0x6b9   : > { %1823 = vst [vmem:[%s3435_s13 + $0x28] sm:$0xff] %v1815_v52 }
 0x6ba   : > { %v1506_v41 = vpop.f32.mrf.mxu3 }
 0x6bb   : > { %v1517_v59 = vadd.f32 %v1506_v41, %v3418_v46 }
 0x6bc   : > { %v1793_v60 = vpop.f32.mrf.mxu2 }
 0x6bd   : > { %v1804_v12 = vadd.f32 %v1793_v60, %v1517_v59 }
 0x6bf   : > { %v1816_v37 = vadd.f32 %v2324_v19, %v1804_v12 }
 0x6c1   : > { %1824 = vst [vmem:[%s3435_s13 + $0x30] sm:$0xff] %v1816_v37 }
 0x6c2   : > { %v1508_v56 = vpop.f32.mrf.mxu3 }
 0x6c3   : > { %v1518_v47 = vadd.f32 %v1508_v56, %v3420_v54 }
 0x6c4   : > { %v1795_v15 = vpop.f32.mrf.mxu2 }
 0x6c5   : > { %v1805_v17 = vadd.f32 %v1795_v15, %v1518_v47 }
 0x6c7   : > { %v1817_v3 = vadd.f32 %v2324_v19, %v1805_v17 }
 0x6c9   : > { %1825 = vst [vmem:[%s3435_s13 + $0x38] sm:$0xff] %v1817_v3 }
 0x6ca   : > { %2600 = shalt.err (!%p2597_p0)
}
 0x6cb   : > { %s2675_s10 = smov 128   ;;  %s2676_s26 = smov 8  }
 0x6cc   : > { %2236 = dma.vmem_to_hbm [thread:$0]  (%p2799_p3), %s1842_s6, 1024, %s1844_s9, %s1827_s12, %s2675_s10, %s2675_s10, %s2676_s26  }
 0x6cd PF: > { %s1858_s28 = sand.u32 1, %s2643_s18   ;;  %p2253_p5 = pnand %p1963_p11, %p2756_p6 }
 0x6ce   : > { %s1859_s8 = scalar_lea.sflag [#allocation4], %s1858_s28 }
 0x6cf   : > { %p2254_p7 = pneg %p2253_p5 }
 0x6d1   : > { %2638 = dma.done.wait (%p2254_p7), %s1859_s8, 1024  }
 0x6d2   : > { %2640 = vsyncadd (%p2254_p7), %s1859_s8, 4294966272  ;;  %s23_s23 = sadd.s32 1, %s2663_s23   ;;  %s3516_s18 = smov %s2647_s19 }
 0x6d3   : > { %p20_p9 = scmp.ge.s32.totalorder %s23_s23, 4   ;;  %s3517_s19 = smov %s2651_s20 }
 0x6d4   : > { %s3518_s20 = smov %s2815_s27  ;;  %s3519_s21 = smov %s2659_s22 }
 0x6d5   : > { %s3520_s22 = smov %s3522_s15  ;;  %22 = sbr.rel (!%p20_p9) target bundleno = 12 (0xc), region = 97 }
 0x6da   :  { %1865 = vsyncpa [#allocation3], 1 }
 0x6db   :  { %1867 = vsyncpa [#allocation3 + $0x1], 1 }
 0x6dc   :  { %1868 = vsyncpa [#allocation6], 1 }
 0x6dd   :  { %1869 = vsyncpa [#allocation9], 1 }
 0x6de   :  { %1870 = vsyncpa [#allocation4], 1 }
 0x6df   :  { %1872 = vsyncpa [#allocation4 + $0x1], 1 }

</bundles_post_ra>
